<compile_context>
chip_gen: v6e
topology: v6e:2x2x1
jax: 0.10.0
libtpu: 0.0.40
codegen_flags: <defaults>
</compile_context>

<pallas_src>
import functools

import jax
import jax.numpy as jnp
from jax.experimental import pallas as pl
from jax.experimental.pallas import tpu as pltpu


_VMEM_LIMIT = 32 * 1024 * 1024  # explicit scoped-VMEM cap (safe on v5e/v6e/v7x)


def _round_up(x, m):
    return (x + m - 1) // m * m


# ----------------------------- Pallas kernels -------------------------------

def _conv_mm_relu_kernel(p_ref, w_ref, b_ref, o_ref):
    # p_ref: (TILE_M, K) bf16 patches, w_ref: (K, N) bf16, b_ref: (1, N) f32
    acc = jnp.dot(p_ref[...], w_ref[...], preferred_element_type=jnp.float32)
    o_ref[...] = jnp.maximum(acc + b_ref[...], 0.0).astype(o_ref.dtype)


def _conv_pool_head_kernel(p_ref, w_ref, b_ref, fcw_ref, fcb_ref, o_ref,
                           acc_ref, *, valid_s, tile_s, inv_hw):
    # p_ref:   (TILE_S, K)  bf16 patches for one image (spatial tile)
    # w_ref:   (K, C)       bf16 conv3 weight
    # b_ref:   (1, C)       f32 conv3 bias
    # fcw_ref: (C, D_pad)   f32 fc weight (lane-padded)
    # fcb_ref: (1, D_pad)   f32 fc bias  (lane-padded)
    # o_ref:   (1, D_pad)   f32 final latent for this image
    # acc_ref: (1, C)       f32 pooled-sum accumulator across spatial tiles
    s = pl.program_id(1)

    @pl.when(s == 0)
    def _():
        acc_ref[...] = jnp.zeros_like(acc_ref)

    y = jnp.dot(p_ref[...], w_ref[...], preferred_element_type=jnp.float32)
    y = jnp.maximum(y + b_ref[...], 0.0)                      # (TILE_S, C) f32

    # mask rows that are zero-padding beyond the true spatial extent
    rows = s * tile_s + jax.lax.broadcasted_iota(jnp.int32, (tile_s, 1), 0)
    y = jnp.where(rows < valid_s, y, 0.0)
    acc_ref[...] += jnp.sum(y, axis=0, keepdims=True)

    @pl.when(s == pl.num_programs(1) - 1)
    def _():
        pooled = acc_ref[...] * inv_hw                        # adaptive avg pool
        h = jnp.tanh(pooled)                                  # (1, C)
        z = jnp.dot(h, fcw_ref[...],
                    preferred_element_type=jnp.float32) + fcb_ref[...]
        o_ref[...] = jnp.tanh(z)


# ------------------------------ wrappers -------------------------------------

def _im2col_3x3_s2(x_nhwc):
    """im2col for a 3x3 / stride-2 / pad-1 conv.  Returns (B,Ho,Wo,9*C)."""
    B, H, W, C = x_nhwc.shape
    Ho = (H + 2 - 3) // 2 + 1
    Wo = (W + 2 - 3) // 2 + 1
    xp = jnp.pad(x_nhwc, ((0, 0), (1, 1), (1, 1), (0, 0)))
    cols = [xp[:, kh:kh + 2 * Ho:2, kw:kw + 2 * Wo:2, :]
            for kh in range(3) for kw in range(3)]
    patches = jnp.concatenate(cols, axis=-1)        # [kh, kw, cin] ordering
    return patches, Ho, Wo


def _conv3x3_s2_relu(x_nhwc, w, b, *, tile_m=512):
    """3x3 conv, stride 2, pad 1, + ReLU. Returns bf16 NHWC activations."""
    B, _, _, Cin = x_nhwc.shape
    Cout = w.shape[-1]
    K = 9 * Cin

    patches, Ho, Wo = _im2col_3x3_s2(x_nhwc.astype(jnp.bfloat16))
    M = B * Ho * Wo
    p2d = patches.reshape(M, K)

    TILE_M = tile_m if M >= tile_m else _round_up(M, 8)
    M_pad = _round_up(M, TILE_M)
    if M_pad != M:
        p2d = jnp.pad(p2d, ((0, M_pad - M), (0, 0)))

    w2d = w.reshape(K, Cout).astype(jnp.bfloat16)
    b2d = b.reshape(1, Cout).astype(jnp.float32)

    cost = pl.CostEstimate(
        flops=2 * M_pad * K * Cout,
        transcendentals=0,
        bytes_accessed=p2d.size * 2 + w2d.size * 2 + b2d.size * 4 + M_pad * Cout * 2)

    out = pl.pallas_call(
        _conv_mm_relu_kernel,
        out_shape=jax.ShapeDtypeStruct((M_pad, Cout), jnp.bfloat16),
        grid_spec=pltpu.PrefetchScalarGridSpec(
            num_scalar_prefetch=0,
            grid=(M_pad // TILE_M,),
            in_specs=[
                pl.BlockSpec((TILE_M, K), lambda i: (i, 0)),
                pl.BlockSpec((K, Cout), lambda i: (0, 0)),   # weight VMEM-resident
                pl.BlockSpec((1, Cout), lambda i: (0, 0)),
            ],
            out_specs=pl.BlockSpec((TILE_M, Cout), lambda i: (i, 0)),
        ),
        compiler_params=pltpu.CompilerParams(
            dimension_semantics=("parallel",),
            vmem_limit_bytes=_VMEM_LIMIT),
        cost_estimate=cost,
    )(p2d, w2d, b2d)

    return out[:M].reshape(B, Ho, Wo, Cout)


def _conv3x3_s2_relu_gap_head(x_nhwc, w, b, fc_w, fc_b, *, tile_s=512):
    """Conv3 + ReLU + AdaptiveAvgPool2d((1,1)) + tanh + Linear + tanh, fused.

    Returns (B, n_latent_dims) f32."""
    B, _, _, Cin = x_nhwc.shape
    Cout = w.shape[-1]
    K = 9 * Cin
    D = fc_w.shape[-1]
    D_pad = max(_round_up(D, 128), 128)

    patches, Ho, Wo = _im2col_3x3_s2(x_nhwc.astype(jnp.bfloat16))
    S = Ho * Wo
    p3d = patches.reshape(B, S, K)

    TILE_S = tile_s if S >= tile_s else _round_up(S, 8)
    S_pad = _round_up(S, TILE_S)
    if S_pad != S:
        p3d = jnp.pad(p3d, ((0, 0), (0, S_pad - S), (0, 0)))

    w2d = w.reshape(K, Cout).astype(jnp.bfloat16)
    b2d = b.reshape(1, Cout).astype(jnp.float32)
    fcw_p = jnp.zeros((Cout, D_pad), jnp.float32).at[:, :D].set(
        fc_w.astype(jnp.float32))
    fcb_p = jnp.zeros((1, D_pad), jnp.float32).at[:, :D].set(
        fc_b.reshape(1, D).astype(jnp.float32))

    kern = functools.partial(_conv_pool_head_kernel,
                             valid_s=S, tile_s=TILE_S, inv_hw=1.0 / float(S))
    cost = pl.CostEstimate(
        flops=2 * B * S_pad * K * Cout + 2 * B * Cout * D_pad,
        transcendentals=B * (Cout + D_pad),
        bytes_accessed=(p3d.size * 2 + w2d.size * 2 + b2d.size * 4
                        + fcw_p.size * 4 + fcb_p.size * 4 + B * D_pad * 4))

    out = pl.pallas_call(
        kern,
        out_shape=jax.ShapeDtypeStruct((B, 1, D_pad), jnp.float32),
        grid_spec=pltpu.PrefetchScalarGridSpec(
            num_scalar_prefetch=0,
            grid=(B, S_pad // TILE_S),
            in_specs=[
                pl.BlockSpec((None, TILE_S, K), lambda bi, si: (bi, si, 0)),
                pl.BlockSpec((K, Cout), lambda bi, si: (0, 0)),
                pl.BlockSpec((1, Cout), lambda bi, si: (0, 0)),
                pl.BlockSpec((Cout, D_pad), lambda bi, si: (0, 0)),
                pl.BlockSpec((1, D_pad), lambda bi, si: (0, 0)),
            ],
            out_specs=pl.BlockSpec((None, 1, D_pad), lambda bi, si: (bi, 0, 0)),
            scratch_shapes=[pltpu.VMEM((1, Cout), jnp.float32)],
        ),
        compiler_params=pltpu.CompilerParams(
            dimension_semantics=("parallel", "arbitrary"),
            vmem_limit_bytes=_VMEM_LIMIT),
        cost_estimate=cost,
    )(p3d, w2d, b2d, fcw_p, fcb_p)

    return out.reshape(B, D_pad)[:, :D]


def feature_net_forward(x_nchw, params):
    """FeatureNet.forward(x) == FlexibleImageEncoder(x). x: (B,3,H,W) NCHW."""
    x = jnp.transpose(x_nchw, (0, 2, 3, 1)).astype(jnp.float32)        # -> NHWC
    x = _conv3x3_s2_relu(x, params["w1"], params["b1"])                # (B,H/2,W/2,128) bf16
    x = _conv3x3_s2_relu(x, params["w2"], params["b2"])                # (B,H/4,W/4,256) bf16
    z = _conv3x3_s2_relu_gap_head(x, params["w3"], params["b3"],
                                  params["fc_w"], params["fc_b"])      # (B, n_latent_dims)
    return z


def init_params(key, n_latent_dims=4):
    ks = jax.random.split(key, 8)

    def init(k, shape, fan_in):
        return jax.random.normal(k, shape, jnp.float32) / jnp.sqrt(fan_in)

    return {
        "w1": init(ks[0], (3, 3, 3, 128), 27.0),
        "b1": init(ks[1], (128,), 27.0),
        "w2": init(ks[2], (3, 3, 128, 256), 9.0 * 128),
        "b2": init(ks[3], (256,), 9.0 * 128),
        "w3": init(ks[4], (3, 3, 256, 256), 9.0 * 256),
        "b3": init(ks[5], (256,), 9.0 * 256),
        "fc_w": init(ks[6], (256, n_latent_dims), 256.0),
        "fc_b": init(ks[7], (n_latent_dims,), 256.0),
    }


if __name__ == "__main__":
    key = jax.random.PRNGKey(0)
    k_x, k_p = jax.random.split(key)
    # small image consistent with the module's 3-channel input, batch=2
    x = jax.random.normal(k_x, (2, 3, 16, 16), jnp.float32)   # NCHW like PyTorch
    params = init_params(k_p, n_latent_dims=4)

    z = jax.jit(feature_net_forward)(x, params)
    z = jax.block_until_ready(z)
    assert z.shape == (2, 4), z.shape
    assert bool(jnp.all(jnp.isfinite(z)))
    print("KERNEL_OK")
</pallas_src>

<mosaic_0001>
module attributes {stable_mosaic.version = 11 : i64} {
  func.func @_conv_mm_relu_kernel(%arg0: i32, %arg1: memref<128x27xbf16, #tpu.memory_space<vmem>>, %arg2: memref<27x128xbf16, #tpu.memory_space<vmem>>, %arg3: memref<1x128xf32, #tpu.memory_space<vmem>>, %arg4: memref<128x128xbf16, #tpu.memory_space<vmem>>) attributes {dimension_semantics = [#tpu.dimension_semantics<parallel>], iteration_bounds = array<i64: 1>, scalar_prefetch = 0 : i64, scratch_operands = 0 : i64, tpu.core_type = #tpu.core_type<tc>, window_params = [{transform_indices = @transform_0, window_bounds = array<i64: 128, 27>}, {pipeline_mode = #tpu.pipeline_mode<synchronous>, transform_indices = @transform_1, window_bounds = array<i64: 27, 128>}, {pipeline_mode = #tpu.pipeline_mode<synchronous>, transform_indices = @transform_2, window_bounds = array<i64: 1, 128>}, {transform_indices = @transform_3, window_bounds = array<i64: 128, 128>}]} {
    %c0 = arith.constant 0 : index
    %c0_0 = arith.constant 0 : index
    %0 = vector.load %arg1[%c0, %c0_0] : memref<128x27xbf16, #tpu.memory_space<vmem>>, vector<128x27xbf16>
    %c0_1 = arith.constant 0 : index
    %c0_2 = arith.constant 0 : index
    %1 = vector.load %arg2[%c0_1, %c0_2] : memref<27x128xbf16, #tpu.memory_space<vmem>>, vector<27x128xbf16>
    %cst = arith.constant dense<0.000000e+00> : vector<128x128xf32>
    %2 = tpu.matmul %0, %1, %cst {dimension_numbers = #tpu.dot_dimension_numbers<[1], [0], [0], [1], [0, 0, 1, 1], [], []>} : vector<128x27xbf16>, vector<27x128xbf16>, vector<128x128xf32> -> vector<128x128xf32>
    %c0_3 = arith.constant 0 : index
    %c0_4 = arith.constant 0 : index
    %3 = vector.load %arg3[%c0_3, %c0_4] : memref<1x128xf32, #tpu.memory_space<vmem>>, vector<1x128xf32>
    %4 = vector.broadcast %3 : vector<1x128xf32> to vector<128x128xf32>
    %5 = arith.addf %2, %4 : vector<128x128xf32>
    %cst_5 = arith.constant 0.000000e+00 : f32
    %6 = vector.broadcast %cst_5 : f32 to vector<128x128xf32>
    %7 = arith.maximumf %5, %6 : vector<128x128xf32>
    %8 = arith.truncf %7 : vector<128x128xf32> to vector<128x128xbf16>
    %c0_6 = arith.constant 0 : index
    %c0_7 = arith.constant 0 : index
    %9 = vector.load %arg4[%c0_6, %c0_7] : memref<128x128xbf16, #tpu.memory_space<vmem>>, vector<128x128xbf16>
    tpu.vector_store %arg4[%c0_6, %c0_7], %8 {strides = array<i32>} : memref<128x128xbf16, #tpu.memory_space<vmem>>, vector<128x128xbf16>,
    return
  }
  func.func @transform_0(%arg0: i32) -> (i32, i32) {
    %c0_i32 = arith.constant 0 : i32
    %c0_i32_0 = arith.constant 0 : i32
    return %arg0, %c0_i32 : i32, i32
  }
  func.func @transform_1(%arg0: i32) -> (i32, i32) {
    %c0_i32 = arith.constant 0 : i32
    %c0_i32_0 = arith.constant 0 : i32
    %c0_i32_1 = arith.constant 0 : i32
    return %c0_i32, %c0_i32_0 : i32, i32
  }
  func.func @transform_2(%arg0: i32) -> (i32, i32) {
    %c0_i32 = arith.constant 0 : i32
    %c0_i32_0 = arith.constant 0 : i32
    %c0_i32_1 = arith.constant 0 : i32
    return %c0_i32, %c0_i32_0 : i32, i32
  }
  func.func @transform_3(%arg0: i32) -> (i32, i32) {
    %c0_i32 = arith.constant 0 : i32
    %c0_i32_0 = arith.constant 0 : i32
    return %arg0, %c0_i32 : i32, i32
  }
}

module attributes {stable_mosaic.version = 11 : i64} {
  func.func @_conv_mm_relu_kernel(%arg0: i32, %arg1: memref<32x1152xbf16, #tpu.memory_space<vmem>>, %arg2: memref<1152x256xbf16, #tpu.memory_space<vmem>>, %arg3: memref<1x256xf32, #tpu.memory_space<vmem>>, %arg4: memref<32x256xbf16, #tpu.memory_space<vmem>>) attributes {dimension_semantics = [#tpu.dimension_semantics<parallel>], iteration_bounds = array<i64: 1>, scalar_prefetch = 0 : i64, scratch_operands = 0 : i64, tpu.core_type = #tpu.core_type<tc>, window_params = [{transform_indices = @transform_0, window_bounds = array<i64: 32, 1152>}, {pipeline_mode = #tpu.pipeline_mode<synchronous>, transform_indices = @transform_1, window_bounds = array<i64: 1152, 256>}, {pipeline_mode = #tpu.pipeline_mode<synchronous>, transform_indices = @transform_2, window_bounds = array<i64: 1, 256>}, {transform_indices = @transform_3, window_bounds = array<i64: 32, 256>}]} {
    %c0 = arith.constant 0 : index
    %c0_0 = arith.constant 0 : index
    %0 = vector.load %arg1[%c0, %c0_0] : memref<32x1152xbf16, #tpu.memory_space<vmem>>, vector<32x1152xbf16>
    %c0_1 = arith.constant 0 : index
    %c0_2 = arith.constant 0 : index
    %1 = vector.load %arg2[%c0_1, %c0_2] : memref<1152x256xbf16, #tpu.memory_space<vmem>>, vector<1152x256xbf16>
    %cst = arith.constant dense<0.000000e+00> : vector<32x256xf32>
    %2 = tpu.matmul %0, %1, %cst {dimension_numbers = #tpu.dot_dimension_numbers<[1], [0], [0], [1], [0, 0, 1, 1], [], []>} : vector<32x1152xbf16>, vector<1152x256xbf16>, vector<32x256xf32> -> vector<32x256xf32>
    %c0_3 = arith.constant 0 : index
    %c0_4 = arith.constant 0 : index
    %3 = vector.load %arg3[%c0_3, %c0_4] : memref<1x256xf32, #tpu.memory_space<vmem>>, vector<1x256xf32>
    %4 = vector.broadcast %3 : vector<1x256xf32> to vector<32x256xf32>
    %5 = arith.addf %2, %4 : vector<32x256xf32>
    %cst_5 = arith.constant 0.000000e+00 : f32
    %6 = vector.broadcast %cst_5 : f32 to vector<32x256xf32>
    %7 = arith.maximumf %5, %6 : vector<32x256xf32>
    %8 = arith.truncf %7 : vector<32x256xf32> to vector<32x256xbf16>
    %c0_6 = arith.constant 0 : index
    %c0_7 = arith.constant 0 : index
    %9 = vector.load %arg4[%c0_6, %c0_7] : memref<32x256xbf16, #tpu.memory_space<vmem>>, vector<32x256xbf16>
    tpu.vector_store %arg4[%c0_6, %c0_7], %8 {strides = array<i32>} : memref<32x256xbf16, #tpu.memory_space<vmem>>, vector<32x256xbf16>,
    return
  }
  func.func @transform_0(%arg0: i32) -> (i32, i32) {
    %c0_i32 = arith.constant 0 : i32
    %c0_i32_0 = arith.constant 0 : i32
    return %arg0, %c0_i32 : i32, i32
  }
  func.func @transform_1(%arg0: i32) -> (i32, i32) {
    %c0_i32 = arith.constant 0 : i32
    %c0_i32_0 = arith.constant 0 : i32
    %c0_i32_1 = arith.constant 0 : i32
    return %c0_i32, %c0_i32_0 : i32, i32
  }
  func.func @transform_2(%arg0: i32) -> (i32, i32) {
    %c0_i32 = arith.constant 0 : i32
    %c0_i32_0 = arith.constant 0 : i32
    %c0_i32_1 = arith.constant 0 : i32
    return %c0_i32, %c0_i32_0 : i32, i32
  }
  func.func @transform_3(%arg0: i32) -> (i32, i32) {
    %c0_i32 = arith.constant 0 : i32
    %c0_i32_0 = arith.constant 0 : i32
    return %arg0, %c0_i32 : i32, i32
  }
}

module attributes {stable_mosaic.version = 11 : i64} {
  func.func @_conv_pool_head_kernel(%arg0: i32, %arg1: i32, %arg2: memref<1x8x2304xbf16, #tpu.memory_space<vmem>>, %arg3: memref<2304x256xbf16, #tpu.memory_space<vmem>>, %arg4: memref<1x256xf32, #tpu.memory_space<vmem>>, %arg5: memref<256x128xf32, #tpu.memory_space<vmem>>, %arg6: memref<1x128xf32, #tpu.memory_space<vmem>>, %arg7: memref<1x1x128xf32, #tpu.memory_space<vmem>>, %arg8: memref<1x256xf32, #tpu.memory_space<vmem>>) attributes {dimension_semantics = [#tpu.dimension_semantics<parallel>, #tpu.dimension_semantics<arbitrary>], iteration_bounds = array<i64: 2, 1>, scalar_prefetch = 0 : i64, scratch_operands = 1 : i64, tpu.core_type = #tpu.core_type<tc>, window_params = [{transform_indices = @transform_0, window_bounds = array<i64: 1, 8, 2304>}, {pipeline_mode = #tpu.pipeline_mode<synchronous>, transform_indices = @transform_1, window_bounds = array<i64: 2304, 256>}, {pipeline_mode = #tpu.pipeline_mode<synchronous>, transform_indices = @transform_2, window_bounds = array<i64: 1, 256>}, {pipeline_mode = #tpu.pipeline_mode<synchronous>, transform_indices = @transform_3, window_bounds = array<i64: 256, 128>}, {pipeline_mode = #tpu.pipeline_mode<synchronous>, transform_indices = @transform_4, window_bounds = array<i64: 1, 128>}, {transform_indices = @transform_5, window_bounds = array<i64: 1, 1, 128>}]} {
    %c0_i32 = arith.constant 0 : i32
    %0 = arith.cmpi eq, %arg1, %c0_i32 : i32
    %1 = arith.extui %0 : i1 to i32
    %c0_i32_0 = arith.constant 0 : i32
    %2 = arith.cmpi ne, %1, %c0_i32_0 : i32
    scf.if %2 {
      %cst_16 = arith.constant 0.000000e+00 : f32
      %30 = vector.broadcast %cst_16 : f32 to vector<1x256xf32>
      %c0_17 = arith.constant 0 : index
      %c0_18 = arith.constant 0 : index
      %31 = vector.load %arg8[%c0_17, %c0_18] : memref<1x256xf32, #tpu.memory_space<vmem>>, vector<1x256xf32>
      tpu.vector_store %arg8[%c0_17, %c0_18], %30 {strides = array<i32>} : memref<1x256xf32, #tpu.memory_space<vmem>>, vector<1x256xf32>,
    } else {
    }
    %c0 = arith.constant 0 : index
    %c0_1 = arith.constant 0 : index
    %c0_2 = arith.constant 0 : index
    %3 = vector.load %arg2[%c0, %c0_1, %c0_2] : memref<1x8x2304xbf16, #tpu.memory_space<vmem>>, vector<1x8x2304xbf16>
    %4 = vector.shape_cast %3 : vector<1x8x2304xbf16> to vector<8x2304xbf16>
    %c0_3 = arith.constant 0 : index
    %c0_4 = arith.constant 0 : index
    %5 = vector.load %arg3[%c0_3, %c0_4] : memref<2304x256xbf16, #tpu.memory_space<vmem>>, vector<2304x256xbf16>
    %cst = arith.constant dense<0.000000e+00> : vector<8x256xf32>
    %6 = tpu.matmul %4, %5, %cst {dimension_numbers = #tpu.dot_dimension_numbers<[1], [0], [0], [1], [0, 0, 1, 1], [], []>} : vector<8x2304xbf16>, vector<2304x256xbf16>, vector<8x256xf32> -> vector<8x256xf32>
    %c0_5 = arith.constant 0 : index
    %c0_6 = arith.constant 0 : index
    %7 = vector.load %arg4[%c0_5, %c0_6] : memref<1x256xf32, #tpu.memory_space<vmem>>, vector<1x256xf32>
    %8 = vector.broadcast %7 : vector<1x256xf32> to vector<8x256xf32>
    %9 = arith.addf %6, %8 : vector<8x256xf32>
    %cst_7 = arith.constant 0.000000e+00 : f32
    %10 = vector.broadcast %cst_7 : f32 to vector<8x256xf32>
    %11 = arith.maximumf %9, %10 : vector<8x256xf32>
    %c8_i32 = arith.constant 8 : i32
    %12 = arith.muli %arg1, %c8_i32 : i32
    %13 = tpu.iota {dimensions = array<i32: 0>} : vector<8x1xi32>
    %14 = vector.broadcast %12 : i32 to vector<8x1xi32>
    %15 = arith.addi %14, %13 : vector<8x1xi32>
    %c4_i32 = arith.constant 4 : i32
    %16 = vector.broadcast %c4_i32 : i32 to vector<8x1xi32>
    %17 = arith.cmpi slt, %15, %16 : vector<8x1xi32>
    %cst_8 = arith.constant 0.000000e+00 : f32
    %18 = vector.shape_cast %17 : vector<8x1xi1> to vector<8x1xi1>
    %19 = vector.broadcast %18 : vector<8x1xi1> to vector<8x256xi1>
    %20 = vector.broadcast %cst_8 : f32 to vector<8x256xf32>
    %21 = arith.select %19, %11, %20 : vector<8x256xi1>, vector<8x256xf32>
    %c0_9 = arith.constant 0 : index
    %c0_10 = arith.constant 0 : index
    %22 = vector.load %arg8[%c0_9, %c0_10] : memref<1x256xf32, #tpu.memory_space<vmem>>, vector<1x256xf32>
    %cst_11 = arith.constant dense<0.000000e+00> : vector<256xf32>
    %23 = vector.multi_reduction <add>, %21, %cst_11 [0] : vector<8x256xf32> to vector<256xf32>
    %24 = vector.shape_cast %23 : vector<256xf32> to vector<1x256xf32>
    %25 = arith.addf %22, %24 : vector<1x256xf32>
    %c0_12 = arith.constant 0 : index
    %c0_13 = arith.constant 0 : index
    %26 = vector.load %arg8[%c0_12, %c0_13] : memref<1x256xf32, #tpu.memory_space<vmem>>, vector<1x256xf32>
    tpu.vector_store %arg8[%c0_12, %c0_13], %25 {strides = array<i32>} : memref<1x256xf32, #tpu.memory_space<vmem>>, vector<1x256xf32>,
    %c0_i32_14 = arith.constant 0 : i32
    %27 = arith.cmpi eq, %arg1, %c0_i32_14 : i32
    %28 = arith.extui %27 : i1 to i32
    %c0_i32_15 = arith.constant 0 : i32
    %29 = arith.cmpi ne, %28, %c0_i32_15 : i32
    scf.if %29 {
      %c0_16 = arith.constant 0 : index
      %c0_17 = arith.constant 0 : index
      %30 = vector.load %arg8[%c0_16, %c0_17] : memref<1x256xf32, #tpu.memory_space<vmem>>, vector<1x256xf32>
      %cst_18 = arith.constant 2.500000e-01 : f32
      %31 = vector.broadcast %cst_18 : f32 to vector<1x256xf32>
      %32 = arith.mulf %30, %31 : vector<1x256xf32>
      %33 = math.tanh %32 : vector<1x256xf32>
      %c0_19 = arith.constant 0 : index
      %c0_20 = arith.constant 0 : index
      %34 = vector.load %arg5[%c0_19, %c0_20] : memref<256x128xf32, #tpu.memory_space<vmem>>, vector<256x128xf32>
      %cst_21 = arith.constant dense<0.000000e+00> : vector<1x128xf32>
      %35 = tpu.matmul %33, %34, %cst_21 {dimension_numbers = #tpu.dot_dimension_numbers<[1], [0], [0], [1], [0, 0, 1, 1], [], []>} : vector<1x256xf32>, vector<256x128xf32>, vector<1x128xf32> -> vector<1x128xf32>
      %c0_22 = arith.constant 0 : index
      %c0_23 = arith.constant 0 : index
      %36 = vector.load %arg6[%c0_22, %c0_23] : memref<1x128xf32, #tpu.memory_space<vmem>>, vector<1x128xf32>
      %37 = arith.addf %35, %36 : vector<1x128xf32>
      %38 = math.tanh %37 : vector<1x128xf32>
      %c0_24 = arith.constant 0 : index
      %c0_25 = arith.constant 0 : index
      %c0_26 = arith.constant 0 : index
      %39 = vector.load %arg7[%c0_24, %c0_25, %c0_26] : memref<1x1x128xf32, #tpu.memory_space<vmem>>, vector<1x1x128xf32>
      %40 = vector.shape_cast %39 : vector<1x1x128xf32> to vector<1x128xf32>
      %41 = vector.shape_cast %38 : vector<1x128xf32> to vector<1x1x128xf32>
      tpu.vector_store %arg7[%c0_24, %c0_25, %c0_26], %41 {strides = array<i32>} : memref<1x1x128xf32, #tpu.memory_space<vmem>>, vector<1x1x128xf32>,
    } else {
    }
    return
  }
  func.func @transform_0(%arg0: i32, %arg1: i32) -> (i32, i32, i32) {
    %c0_i32 = arith.constant 0 : i32
    %c0_i32_0 = arith.constant 0 : i32
    return %arg0, %arg1, %c0_i32 : i32, i32, i32
  }
  func.func @transform_1(%arg0: i32, %arg1: i32) -> (i32, i32) {
    %c0_i32 = arith.constant 0 : i32
    %c0_i32_0 = arith.constant 0 : i32
    %c0_i32_1 = arith.constant 0 : i32
    return %c0_i32, %c0_i32_0 : i32, i32
  }
  func.func @transform_2(%arg0: i32, %arg1: i32) -> (i32, i32) {
    %c0_i32 = arith.constant 0 : i32
    %c0_i32_0 = arith.constant 0 : i32
    %c0_i32_1 = arith.constant 0 : i32
    return %c0_i32, %c0_i32_0 : i32, i32
  }
  func.func @transform_3(%arg0: i32, %arg1: i32) -> (i32, i32) {
    %c0_i32 = arith.constant 0 : i32
    %c0_i32_0 = arith.constant 0 : i32
    %c0_i32_1 = arith.constant 0 : i32
    return %c0_i32, %c0_i32_0 : i32, i32
  }
  func.func @transform_4(%arg0: i32, %arg1: i32) -> (i32, i32) {
    %c0_i32 = arith.constant 0 : i32
    %c0_i32_0 = arith.constant 0 : i32
    %c0_i32_1 = arith.constant 0 : i32
    return %c0_i32, %c0_i32_0 : i32, i32
  }
  func.func @transform_5(%arg0: i32, %arg1: i32) -> (i32, i32, i32) {
    %c0_i32 = arith.constant 0 : i32
    %c0_i32_0 = arith.constant 0 : i32
    %c0_i32_1 = arith.constant 0 : i32
    return %arg0, %c0_i32, %c0_i32_0 : i32, i32, i32
  }
}

</mosaic_0001>

<bundles_post_ra>
// kernel: feature_net_forward.3
= control target key start
LH: loop header
LB: loop body
LE: loop exit
PB: predicated region body
PF: predicated region fallthrough
CT: control target
= control target key end

     0   :  { %8 = vsyncpa [#allocation3], 0  ;;  %s501_s12 = smov [#allocation2]   ;;  %s588_s0 = inlined_call_operand.vmem [shape: bf16[128,27], index: 0, kind: input, shape index: {}]   ;;  %s589_s1 = inlined_call_operand.vmem [shape: bf16[27,128], index: 1, kind: input, shape index: {}]   ;;  %s590_s2 = inlined_call_operand.hbm [shape: f32[1,128], index: 2, kind: input, shape index: {}]   ;;  %s591_s3 = inlined_call_operand.vmem [shape: bf16[128,128], index: 3, kind: output, shape index: {}]  }
   0x1   :  { %s19_s13 = sshll.u32 %s501_s12, 4  ;;  %s20_s13 = int_to_ptr.vmem [resolvable:$true] %s19_s13 }
   0x2   :  { %s487_s14 = scalar_lea.vmem %s20_s13, 16  ;;  %s491_s15 = scalar_lea.vmem %s20_s13, 32 }
   0x3   :  { %p488_p0 = scmp.ne.s32.totalorder %s20_s13, %s487_s14  ;;  %p492_p1 = scmp.lt.s32.totalorder %s20_s13, %s20_s13 }
   0x4   :  { %p493_p2 = scmp.lt.s32.totalorder %s491_s15, %s487_s14 }
   0x6   :  { %p494_p3 = por %p493_p2, %p492_p1 }
   0x8   :  { %p495_p4 = pnand %p494_p3, %p488_p0 }
   0xa   :  { %498 = shalt.err (!%p495_p4)
}
   0xb   :  { %22 = dma.hbm_to_vmem [thread:$0]  %s590_s2, 16, %s20_s13, [#allocation3]  }
   0xc   :  { %499 = dma.done.wait [#allocation3], 16  }
   0xd   :  { %500 = vsyncadd [#allocation3], 4294967280  ;;  %vm130_vm0 = vcmask 1044480   ;;  %vm131_vm1 = vcmask 1045504   ;;  %v502_v0 = vmov 65535   ;;  %v470_v4 = vld [vmem:[%s589_s1] sm:$0xff]  }
   0xe   :  { %v132_v1 = vsel %vm130_vm0, 4294967295, %v502_v0  ;;  %v469_v3 = vld [vmem:[%s589_s1 + $0x8] sm:$0x3f]   ;;  %v471_v6 = vld [vmem:[%s588_s0] sm:$0xff]   ;;  %vm105_vm2 = vcmask 220160   ;;  %v475_v10 = vld [vmem:[%s588_s0 + $0x10] sm:$0xff]  }
   0xf   :  { %v133_v2 = vsel %vm131_vm1, %v132_v1, 0  ;;  %v472_v7 = vld [vmem:[%s588_s0 + $0x20] sm:$0xff]   ;;  %v473_v8 = vld [vmem:[%s588_s0 + $0x8] sm:$0xff]   ;;  %447 = vmatprep.mubr.msk.bf16.mxu0 %vm105_vm2, %v471_v6  ;;  %v476_v11 = vld [vmem:[%s588_s0 + $0x30] sm:$0xff]  }
  0x10   :  { %v135_v5 = vand.u32 %v469_v3, %v133_v2  ;;  %455 = vmatprep.mubr.msk.bf16.mxu1 %vm105_vm2, %v472_v7  ;;  %v474_v9 = vld [vmem:[%s588_s0 + $0x28] sm:$0xff]   ;;  %v477_v12 = vld [vmem:[%s588_s0 + $0x18] sm:$0xff]   ;;  %v335_v14 = vld [vmem:[#allocation2] ss:$0 sm:$0xff] }
  0x11   :  { %v478_v13 = vld [vmem:[%s588_s0 + $0x38] sm:$0xff]  }
  0x12   :  { %443 = vmatprep.subr.bf16.mxu0 %v135_v5  ;;  %463 = vmatprep.subr.bf16.mxu1 %v135_v5 }
  0x13   :  { %444 = vmatpush3.bf16.msra.mxu0 %v135_v5  ;;  %465 = vmatpush3.bf16.msra.mxu1 %v135_v5 }
  0x14   :  { %445 = vmatprep.subr.bf16.mxu0 %v470_v4  ;;  %464 = vmatprep.subr.bf16.mxu1 %v470_v4 }
  0x17   :  { %446 = vmatpush3.bf16.msra.mxu0 %v470_v4  ;;  %466 = vmatpush3.bf16.msra.mxu1 %v470_v4 }
  0x1a   :  { %448 = vmatmul.mubr.msk.bf16.vlgmr.msra.gmra.mxu0 %vm105_vm2, %v473_v8  ;;  %456 = vmatmul.mubr.msk.bf16.vlgmr.msra.gmra.mxu1 %vm105_vm2, %v474_v9 }
  0x1b   :  { %451 = vmatprep.mubr.msk.bf16.mxu0 %vm105_vm2, %v475_v10  ;;  %459 = vmatprep.mubr.msk.bf16.mxu1 %vm105_vm2, %v476_v11 }
  0x22   :  { %452 = vmatmul.mubr.msk.bf16.gmra.mxu0 %vm105_vm2, %v477_v12  ;;  %460 = vmatmul.mubr.msk.bf16.gmra.mxu1 %vm105_vm2, %v478_v13 }
  0xda   :  { %v449_v15 = vpop.f32.mrf.mxu0  ;;  %v457_v16 = vpop.f32.mrf.mxu1 }
  0xdb   :  { %v180_v17 = vadd.f32 %v449_v15, %v335_v14  ;;  %v212_v18 = vadd.f32 %v457_v16, %v335_v14 }
  0xdc   :  { %v171_v19 = vpop.f32.mrf.mxu0  ;;  %v203_v20 = vpop.f32.mrf.mxu1 }
  0xdd   :  { %v172_v21 = vadd.f32 %v335_v14, %v171_v19  ;;  %v204_v22 = vadd.f32 %v335_v14, %v203_v20  ;;  %v236_v27 = vmax.f32 %v180_v17, 0.0  ;;  %v244_v28 = vmax.f32 %v212_v18, 0.0 }
  0xde   :  { %v450_v23 = vpop.f32.mrf.mxu0  ;;  %v458_v24 = vpop.f32.mrf.mxu1 }
  0xdf   :  { %v183_v25 = vadd.f32 %v450_v23, %v335_v14  ;;  %v215_v26 = vadd.f32 %v458_v24, %v335_v14  ;;  %v234_v35 = vmax.f32 %v172_v21, 0.0  ;;  %v242_v36 = vmax.f32 %v204_v22, 0.0 }
  0xe0   :  { %v174_v29 = vpop.f32.mrf.mxu0  ;;  %v206_v30 = vpop.f32.mrf.mxu1 }
  0xe1   :  { %v237_v31 = vmax.f32 %v183_v25, 0.0  ;;  %v245_v32 = vmax.f32 %v215_v26, 0.0  ;;  %v175_v33 = vadd.f32 %v335_v14, %v174_v29  ;;  %v207_v34 = vadd.f32 %v335_v14, %v206_v30 }
  0xe2   :  { %v453_v37 = vpop.f32.mrf.mxu0  ;;  %v461_v38 = vpop.f32.mrf.mxu1 }
  0xe3   :  { %v394_v39 = vpack.c.bf16 %v237_v31, %v236_v27  ;;  %v414_v40 = vpack.c.bf16 %v245_v32, %v244_v28  ;;  %v235_v41 = vmax.f32 %v175_v33, 0.0  ;;  %v243_v42 = vmax.f32 %v207_v34, 0.0 }
  0xe4   :  { %v196_v43 = vadd.f32 %v453_v37, %v335_v14  ;;  %v228_v44 = vadd.f32 %v461_v38, %v335_v14  ;;  %v187_v45 = vpop.f32.mrf.mxu0  ;;  %v219_v46 = vpop.f32.mrf.mxu1 }
  0xe5   :  { %426 = vst [vmem:[%s591_s3 + $0x8] sm:$0xff] %v394_v39   ;;  %430 = vst [vmem:[%s591_s3 + $0x28] sm:$0xff] %v414_v40   ;;  %v389_v47 = vpack.c.bf16 %v235_v41, %v234_v35  ;;  %v409_v48 = vpack.c.bf16 %v243_v42, %v242_v36  ;;  %v188_v49 = vadd.f32 %v335_v14, %v187_v45 }
  0xe6   :  { %v220_v50 = vadd.f32 %v335_v14, %v219_v46  ;;  %v454_v51 = vpop.f32.mrf.mxu0  ;;  %v462_v52 = vpop.f32.mrf.mxu1  ;;  %v240_v55 = vmax.f32 %v196_v43, 0.0  ;;  %v248_v56 = vmax.f32 %v228_v44, 0.0 }
  0xe7   :  { %390 = vst [vmem:[%s591_s3] sm:$0xff] %v389_v47   ;;  %429 = vst [vmem:[%s591_s3 + $0x20] sm:$0xff] %v409_v48   ;;  %v199_v53 = vadd.f32 %v454_v51, %v335_v14  ;;  %v231_v54 = vadd.f32 %v462_v52, %v335_v14  ;;  %v238_v63 = vmax.f32 %v188_v49, 0.0 }
  0xe8   :  { %v190_v57 = vpop.f32.mrf.mxu0  ;;  %v222_v58 = vpop.f32.mrf.mxu1  ;;  %v246_v0 = vmax.f32 %v220_v50, 0.0 }
  0xe9   :  { %v241_v59 = vmax.f32 %v199_v53, 0.0  ;;  %v249_v60 = vmax.f32 %v231_v54, 0.0  ;;  %v191_v61 = vadd.f32 %v335_v14, %v190_v57  ;;  %v223_v62 = vadd.f32 %v335_v14, %v222_v58 }
  0xeb   :  { %v404_v1 = vpack.c.bf16 %v241_v59, %v240_v55  ;;  %v424_v2 = vpack.c.bf16 %v249_v60, %v248_v56  ;;  %v239_v3 = vmax.f32 %v191_v61, 0.0  ;;  %v247_v4 = vmax.f32 %v223_v62, 0.0 }
  0xed   :  { %428 = vst [vmem:[%s591_s3 + $0x18] sm:$0xff] %v404_v1   ;;  %432 = vst [vmem:[%s591_s3 + $0x38] sm:$0xff] %v424_v2   ;;  %v399_v5 = vpack.c.bf16 %v239_v3, %v238_v63  ;;  %v419_v6 = vpack.c.bf16 %v247_v4, %v246_v0 }
  0xef   :  { %427 = vst [vmem:[%s591_s3 + $0x10] sm:$0xff] %v399_v5   ;;  %431 = vst [vmem:[%s591_s3 + $0x30] sm:$0xff] %v419_v6  }
  0xf0   :  { %334 = vsyncpa [#allocation3], 1 }

// kernel: feature_net_forward.4
= control target key start
LH: loop header
LB: loop body
LE: loop exit
PB: predicated region body
PF: predicated region fallthrough
CT: control target
= control target key end

     0   :  { %s2259_s1 = inlined_call_operand.vmem [shape: bf16[1152,256], index: 1, kind: input, shape index: {}]   ;;  %s2260_s0 = inlined_call_operand.vmem [shape: bf16[32,1152], index: 0, kind: input, shape index: {}]   ;;  %s2261_s2 = inlined_call_operand.vmem [shape: f32[1,256], index: 2, kind: input, shape index: {}]   ;;  %s2262_s3 = inlined_call_operand.vmem [shape: bf16[32,256], index: 3, kind: output, shape index: {}]  }
   0x1   :  { %v1495_v0 = vld [vmem:[%s2259_s1 + $0x74] ss:$8 sps:$4 sm:$0xff]   ;;  %v1499_v2 = vld [vmem:[%s2259_s1 + $0x70] ss:$8 sps:$4 sm:$0xff]   ;;  %v1501_v4 = vld [vmem:[%s2259_s1 + $0x64] ss:$8 sps:$4 sm:$0xff]  }
   0x2   :  { %v1497_v1 = vld [vmem:[%s2259_s1 + $0x174] ss:$8 sps:$4 sm:$0xff]   ;;  %1003 = vmatprep.subr.bf16.mxu0 %v1495_v0  ;;  %v1500_v3 = vld [vmem:[%s2259_s1 + $0x170] ss:$8 sps:$4 sm:$0xff]   ;;  %v1503_v5 = vld [vmem:[%s2259_s1 + $0x164] ss:$8 sps:$4 sm:$0xff]  }
   0x3   :  { %1056 = vmatprep.subr.bf16.mxu1 %v1497_v1  ;;  %1004 = vmatpush1.bf16.msra.mxu0 %v1499_v2  ;;  %v1505_v6 = vld [vmem:[%s2259_s1 + $0x60] ss:$8 sps:$4 sm:$0xff]   ;;  %v1507_v8 = vld [vmem:[%s2259_s1 + $0x54] ss:$8 sps:$4 sm:$0xff]   ;;  %v1511_v10 = vld [vmem:[%s2259_s1 + $0x50] ss:$8 sps:$4 sm:$0xff]  }
   0x4   :  { %1057 = vmatpush1.bf16.msra.mxu1 %v1500_v3  ;;  %1005 = vmatprep.subr.bf16.mxu0 %v1501_v4  ;;  %v1506_v7 = vld [vmem:[%s2259_s1 + $0x160] ss:$8 sps:$4 sm:$0xff]   ;;  %v1509_v9 = vld [vmem:[%s2259_s1 + $0x154] ss:$8 sps:$4 sm:$0xff]   ;;  %v1512_v11 = vld [vmem:[%s2259_s1 + $0x150] ss:$8 sps:$4 sm:$0xff]  }
   0x5   :  { %1058 = vmatprep.subr.bf16.mxu1 %v1503_v5  ;;  %v1513_v12 = vld [vmem:[%s2259_s1 + $0x44] ss:$8 sps:$4 sm:$0xff]   ;;  %v1517_v14 = vld [vmem:[%s2259_s1 + $0x40] ss:$8 sps:$4 sm:$0xff]   ;;  %v1519_v16 = vld [vmem:[%s2259_s1 + $0x34] ss:$8 sps:$4 sm:$0xff]  }
   0x6   :  { %v1515_v13 = vld [vmem:[%s2259_s1 + $0x144] ss:$8 sps:$4 sm:$0xff]   ;;  %v1518_v15 = vld [vmem:[%s2259_s1 + $0x140] ss:$8 sps:$4 sm:$0xff]   ;;  %v1521_v17 = vld [vmem:[%s2259_s1 + $0x134] ss:$8 sps:$4 sm:$0xff]  }
   0x7   :  { %1006 = vmatpush1.bf16.msra.mxu0 %v1505_v6  ;;  %v1523_v18 = vld [vmem:[%s2259_s1 + $0x30] ss:$8 sps:$4 sm:$0xff]   ;;  %v1525_v20 = vld [vmem:[%s2259_s1 + $0x24] ss:$8 sps:$4 sm:$0xff]   ;;  %v1529_v22 = vld [vmem:[%s2259_s1 + $0x20] ss:$8 sps:$4 sm:$0xff]  }
   0x8   :  { %1059 = vmatpush1.bf16.msra.mxu1 %v1506_v7  ;;  %1007 = vmatprep.subr.bf16.mxu0 %v1507_v8  ;;  %v1524_v19 = vld [vmem:[%s2259_s1 + $0x130] ss:$8 sps:$4 sm:$0xff]   ;;  %v1527_v21 = vld [vmem:[%s2259_s1 + $0x124] ss:$8 sps:$4 sm:$0xff]   ;;  %v1530_v23 = vld [vmem:[%s2259_s1 + $0x120] ss:$8 sps:$4 sm:$0xff]  }
   0x9   :  { %1060 = vmatprep.subr.bf16.mxu1 %v1509_v9  ;;  %v1531_v24 = vld [vmem:[%s2259_s1 + $0x14] ss:$8 sps:$4 sm:$0xff]   ;;  %v1535_v26 = vld [vmem:[%s2259_s1 + $0x10] ss:$8 sps:$4 sm:$0xff]   ;;  %v1537_v28 = vld [vmem:[%s2259_s1 + $0x4] ss:$8 sps:$4 sm:$0xff]  }
   0xa   :  { %v1533_v25 = vld [vmem:[%s2259_s1 + $0x114] ss:$8 sps:$4 sm:$0xff]   ;;  %v1536_v27 = vld [vmem:[%s2259_s1 + $0x110] ss:$8 sps:$4 sm:$0xff]   ;;  %v1539_v29 = vld [vmem:[%s2259_s1 + $0x104] ss:$8 sps:$4 sm:$0xff]  }
   0xb   :  { %1008 = vmatpush1.bf16.msra.mxu0 %v1511_v10  ;;  %v1541_v30 = vld [vmem:[%s2259_s1] ss:$8 sps:$4 sm:$0xff]   ;;  %v1543_v32 = vld [vmem:[%s2259_s1 + $0xf4] ss:$8 sps:$4 sm:$0xff]   ;;  %v1547_v34 = vld [vmem:[%s2259_s1 + $0xf0] ss:$8 sps:$4 sm:$0xff]  }
   0xc   :  { %1061 = vmatpush1.bf16.msra.mxu1 %v1512_v11  ;;  %1009 = vmatprep.subr.bf16.mxu0 %v1513_v12  ;;  %v1542_v31 = vld [vmem:[%s2259_s1 + $0x100] ss:$8 sps:$4 sm:$0xff]   ;;  %v1545_v33 = vld [vmem:[%s2259_s1 + $0x1f4] ss:$8 sps:$4 sm:$0xff]   ;;  %v1548_v35 = vld [vmem:[%s2259_s1 + $0x1f0] ss:$8 sps:$4 sm:$0xff]  }
   0xd   :  { %1062 = vmatprep.subr.bf16.mxu1 %v1515_v13  ;;  %v1549_v36 = vld [vmem:[%s2259_s1 + $0xe4] ss:$8 sps:$4 sm:$0xff]   ;;  %v1553_v38 = vld [vmem:[%s2259_s1 + $0xe0] ss:$8 sps:$4 sm:$0xff]   ;;  %v1555_v40 = vld [vmem:[%s2259_s1 + $0xd4] ss:$8 sps:$4 sm:$0xff]  }
   0xe   :  { %v1551_v37 = vld [vmem:[%s2259_s1 + $0x1e4] ss:$8 sps:$4 sm:$0xff]   ;;  %v1554_v39 = vld [vmem:[%s2259_s1 + $0x1e0] ss:$8 sps:$4 sm:$0xff]   ;;  %v1557_v41 = vld [vmem:[%s2259_s1 + $0x1d4] ss:$8 sps:$4 sm:$0xff]  }
   0xf   :  { %1010 = vmatpush1.bf16.msra.mxu0 %v1517_v14  ;;  %v1559_v42 = vld [vmem:[%s2259_s1 + $0xd0] ss:$8 sps:$4 sm:$0xff]   ;;  %v1561_v44 = vld [vmem:[%s2259_s1 + $0xc4] ss:$8 sps:$4 sm:$0xff]   ;;  %v1565_v46 = vld [vmem:[%s2259_s1 + $0xc0] ss:$8 sps:$4 sm:$0xff]  }
  0x10   :  { %1063 = vmatpush1.bf16.msra.mxu1 %v1518_v15  ;;  %1011 = vmatprep.subr.bf16.mxu0 %v1519_v16  ;;  %v1560_v43 = vld [vmem:[%s2259_s1 + $0x1d0] ss:$8 sps:$4 sm:$0xff]   ;;  %v1563_v45 = vld [vmem:[%s2259_s1 + $0x1c4] ss:$8 sps:$4 sm:$0xff]   ;;  %v1566_v47 = vld [vmem:[%s2259_s1 + $0x1c0] ss:$8 sps:$4 sm:$0xff]  }
  0x11   :  { %1064 = vmatprep.subr.bf16.mxu1 %v1521_v17  ;;  %v1567_v48 = vld [vmem:[%s2259_s1 + $0xb4] ss:$8 sps:$4 sm:$0xff]   ;;  %v1593_v49 = vld [vmem:[%s2260_s0 + $0x4] ss:$36 sps:$4 sm:$0xff]   ;;  %v1596_v51 = vld [vmem:[%s2260_s0 + $0xc] ss:$36 sps:$4 sm:$0xff]  }
  0x12   :  { %v1569_v50 = vld [vmem:[%s2259_s1 + $0x1b4] ss:$8 sps:$4 sm:$0xff]   ;;  %1035 = vmatprep.mubr.bf16.mxu0 %v1593_v49  ;;  %v1571_v52 = vld [vmem:[%s2259_s1 + $0xb0] ss:$8 sps:$4 sm:$0xff]   ;;  %1088 = vmatprep.mubr.bf16.mxu1 %v1596_v51  ;;  %v1573_v54 = vld [vmem:[%s2259_s1 + $0xa4] ss:$8 sps:$4 sm:$0xff]  }
  0x13   :  { %1012 = vmatpush1.bf16.msra.mxu0 %v1523_v18  ;;  %v1572_v53 = vld [vmem:[%s2259_s1 + $0x1b0] ss:$8 sps:$4 sm:$0xff]   ;;  %v1575_v55 = vld [vmem:[%s2259_s1 + $0x1a4] ss:$8 sps:$4 sm:$0xff]   ;;  %v1577_v56 = vld [vmem:[%s2259_s1 + $0xa0] ss:$8 sps:$4 sm:$0xff]  }
  0x14   :  { %1065 = vmatpush1.bf16.msra.mxu1 %v1524_v19  ;;  %1013 = vmatprep.subr.bf16.mxu0 %v1525_v20  ;;  %v1578_v57 = vld [vmem:[%s2259_s1 + $0x1a0] ss:$8 sps:$4 sm:$0xff]   ;;  %v1579_v58 = vld [vmem:[%s2259_s1 + $0x94] ss:$8 sps:$4 sm:$0xff]   ;;  %v1583_v60 = vld [vmem:[%s2259_s1 + $0x90] ss:$8 sps:$4 sm:$0xff]  }
  0x15   :  { %1066 = vmatprep.subr.bf16.mxu1 %v1527_v21  ;;  %v1581_v59 = vld [vmem:[%s2259_s1 + $0x194] ss:$8 sps:$4 sm:$0xff]   ;;  %v1584_v61 = vld [vmem:[%s2259_s1 + $0x190] ss:$8 sps:$4 sm:$0xff]   ;;  %v1585_v62 = vld [vmem:[%s2259_s1 + $0x84] ss:$8 sps:$4 sm:$0xff]  }
  0x16   :  { %v1587_v63 = vld [vmem:[%s2259_s1 + $0x184] ss:$8 sps:$4 sm:$0xff]   ;;  %v1589_v0 = vld [vmem:[%s2259_s1 + $0x80] ss:$8 sps:$4 sm:$0xff]   ;;  %v1599_v2 = vld [vmem:[%s2259_s1 + $0x274] ss:$8 sps:$4 sm:$0xff]  }
  0x17   :  { %1014 = vmatpush1.bf16.msra.mxu0 %v1529_v22  ;;  %v1590_v1 = vld [vmem:[%s2259_s1 + $0x180] ss:$8 sps:$4 sm:$0xff]   ;;  %v1602_v3 = vld [vmem:[%s2259_s1 + $0x374] ss:$8 sps:$4 sm:$0xff]   ;;  %v1597_v6 = vld [vmem:[%s2259_s1 + $0x270] ss:$8 sps:$4 sm:$0xff]  }
  0x18   :  { %1067 = vmatpush1.bf16.msra.mxu1 %v1530_v23  ;;  %1015 = vmatprep.subr.bf16.mxu0 %v1531_v24  ;;  %v1591_v4 = vld [vmem:[%s2260_s0] ss:$36 sps:$4 sm:$0xff]   ;;  %v1594_v5 = vld [vmem:[%s2260_s0 + $0x8] ss:$36 sps:$4 sm:$0xff]   ;;  %v1600_v7 = vld [vmem:[%s2259_s1 + $0x370] ss:$8 sps:$4 sm:$0xff]  }
  0x19   :  { %1068 = vmatprep.subr.bf16.mxu1 %v1533_v25  ;;  %v1605_v8 = vld [vmem:[%s2259_s1 + $0x264] ss:$8 sps:$4 sm:$0xff]   ;;  %v1603_v10 = vld [vmem:[%s2259_s1 + $0x260] ss:$8 sps:$4 sm:$0xff]   ;;  %v1611_v12 = vld [vmem:[%s2259_s1 + $0x254] ss:$8 sps:$4 sm:$0xff]  }
  0x1a   :  { %v1608_v9 = vld [vmem:[%s2259_s1 + $0x364] ss:$8 sps:$4 sm:$0xff]   ;;  %v1606_v11 = vld [vmem:[%s2259_s1 + $0x360] ss:$8 sps:$4 sm:$0xff]   ;;  %v1614_v13 = vld [vmem:[%s2259_s1 + $0x354] ss:$8 sps:$4 sm:$0xff]  }
  0x1b   :  { %1016 = vmatpush1.bf16.msra.mxu0 %v1535_v26  ;;  %v1609_v14 = vld [vmem:[%s2259_s1 + $0x250] ss:$8 sps:$4 sm:$0xff]   ;;  %v1617_v16 = vld [vmem:[%s2259_s1 + $0x244] ss:$8 sps:$4 sm:$0xff]   ;;  %v1615_v18 = vld [vmem:[%s2259_s1 + $0x240] ss:$8 sps:$4 sm:$0xff]  }
  0x1c   :  { %1069 = vmatpush1.bf16.msra.mxu1 %v1536_v27  ;;  %1017 = vmatprep.subr.bf16.mxu0 %v1537_v28  ;;  %v1612_v15 = vld [vmem:[%s2259_s1 + $0x350] ss:$8 sps:$4 sm:$0xff]   ;;  %v1620_v17 = vld [vmem:[%s2259_s1 + $0x344] ss:$8 sps:$4 sm:$0xff]   ;;  %v1618_v19 = vld [vmem:[%s2259_s1 + $0x340] ss:$8 sps:$4 sm:$0xff]  }
  0x1d   :  { %1070 = vmatprep.subr.bf16.mxu1 %v1539_v29  ;;  %v1623_v20 = vld [vmem:[%s2259_s1 + $0x234] ss:$8 sps:$4 sm:$0xff]   ;;  %v1669_v22 = vld [vmem:[%s2260_s0 + $0x4c] ss:$36 sps:$4 sm:$0xff]   ;;  %v1627_v28 = vld [vmem:[%s2259_s1 + $0x220] ss:$8 sps:$4 sm:$0xff]  }
  0x1e   :  { %v1626_v21 = vld [vmem:[%s2259_s1 + $0x334] ss:$8 sps:$4 sm:$0xff]   ;;  %v1621_v23 = vld [vmem:[%s2259_s1 + $0x230] ss:$8 sps:$4 sm:$0xff]   ;;  %v1629_v25 = vld [vmem:[%s2259_s1 + $0x224] ss:$8 sps:$4 sm:$0xff]  }
  0x1f   :  { %1018 = vmatpush1.bf16.msra.mxu0 %v1541_v30  ;;  %v1624_v24 = vld [vmem:[%s2259_s1 + $0x330] ss:$8 sps:$4 sm:$0xff]   ;;  %v1632_v26 = vld [vmem:[%s2259_s1 + $0x324] ss:$8 sps:$4 sm:$0xff]   ;;  %v1630_v30 = vld [vmem:[%s2259_s1 + $0x320] ss:$8 sps:$4 sm:$0xff]  }
  0x20   :  { %1071 = vmatpush1.bf16.msra.mxu1 %v1542_v31  ;;  %1019 = vmatprep.subr.bf16.mxu0 %v1543_v32  ;;  %v1677_v27 = vld [vmem:[%s2260_s0 + $0x48] ss:$36 sps:$4 sm:$0xff]   ;;  %v1678_v29 = vld [vmem:[%s2260_s0 + $0x54] ss:$36 sps:$4 sm:$0xff]  }
  0x21   :  { %1072 = vmatprep.subr.bf16.mxu1 %v1545_v33  ;;  %v1680_v31 = vld [vmem:[%s2260_s0 + $0x50] ss:$36 sps:$4 sm:$0xff]   ;;  %v1654_v49 = vld [vmem:[%s2259_s1 + $0x3e0] ss:$8 sps:$4 sm:$0xff]  }
  0x22   :  { %v1635_v32 = vld [vmem:[%s2259_s1 + $0x214] ss:$8 sps:$4 sm:$0xff]  }
  0x23   :  { %1020 = vmatpush2.bf16.msra.mxu0 %v1547_v34  ;;  %v1638_v33 = vld [vmem:[%s2259_s1 + $0x314] ss:$8 sps:$4 sm:$0xff]   ;;  %v1633_v34 = vld [vmem:[%s2259_s1 + $0x210] ss:$8 sps:$4 sm:$0xff]  }
  0x24   :  { %1073 = vmatpush2.bf16.msra.mxu1 %v1548_v35  ;;  %1021 = vmatprep.subr.bf16.mxu0 %v1549_v36  ;;  %v1636_v35 = vld [vmem:[%s2259_s1 + $0x310] ss:$8 sps:$4 sm:$0xff]   ;;  %v1641_v36 = vld [vmem:[%s2259_s1 + $0x204] ss:$8 sps:$4 sm:$0xff]   ;;  %v1662_v51 = vld [vmem:[%s2259_s1 + $0x3d4] ss:$8 sps:$4 sm:$0xff]  }
  0x25   :  { %1074 = vmatprep.subr.bf16.mxu1 %v1551_v37  ;;  %v1644_v37 = vld [vmem:[%s2259_s1 + $0x304] ss:$8 sps:$4 sm:$0xff]  }
  0x27   :  { %1022 = vmatpush2.bf16.msra.mxu0 %v1553_v38  ;;  %v1639_v38 = vld [vmem:[%s2259_s1 + $0x200] ss:$8 sps:$4 sm:$0xff]  }
  0x28   :  { %1075 = vmatpush2.bf16.msra.mxu1 %v1554_v39  ;;  %1023 = vmatprep.subr.bf16.mxu0 %v1555_v40  ;;  %v1642_v39 = vld [vmem:[%s2259_s1 + $0x300] ss:$8 sps:$4 sm:$0xff]   ;;  %v1647_v40 = vld [vmem:[%s2259_s1 + $0x2f4] ss:$8 sps:$4 sm:$0xff]  }
  0x29   :  { %1076 = vmatprep.subr.bf16.mxu1 %v1557_v41  ;;  %v1701_v41 = vld [vmem:[%s2260_s0 + $0x14] ss:$36 sps:$4 sm:$0xff]  }
  0x2b   :  { %1024 = vmatpush2.bf16.msra.mxu0 %v1559_v42  ;;  %v1650_v42 = vld [vmem:[%s2259_s1 + $0x3f4] ss:$8 sps:$4 sm:$0xff]  }
  0x2c   :  { %1077 = vmatpush2.bf16.msra.mxu1 %v1560_v43  ;;  %1025 = vmatprep.subr.bf16.mxu0 %v1561_v44  ;;  %v1704_v43 = vld [vmem:[%s2260_s0 + $0x1c] ss:$36 sps:$4 sm:$0xff]   ;;  %v1645_v44 = vld [vmem:[%s2259_s1 + $0x2f0] ss:$8 sps:$4 sm:$0xff]  }
  0x2d   :  { %1078 = vmatprep.subr.bf16.mxu1 %v1563_v45  ;;  %v1648_v45 = vld [vmem:[%s2259_s1 + $0x3f0] ss:$8 sps:$4 sm:$0xff]  }
  0x2f   :  { %1026 = vmatpush2.bf16.msra.mxu0 %v1565_v46  ;;  %v1653_v46 = vld [vmem:[%s2259_s1 + $0x2e4] ss:$8 sps:$4 sm:$0xff]  }
  0x30   :  { %1079 = vmatpush2.bf16.msra.mxu1 %v1566_v47  ;;  %1027 = vmatprep.subr.bf16.mxu0 %v1567_v48  ;;  %v1656_v47 = vld [vmem:[%s2259_s1 + $0x3e4] ss:$8 sps:$4 sm:$0xff]   ;;  %v1651_v48 = vld [vmem:[%s2259_s1 + $0x2e0] ss:$8 sps:$4 sm:$0xff]  }
  0x31   :  { %1080 = vmatprep.subr.bf16.mxu1 %v1569_v50  ;;  %v1659_v50 = vld [vmem:[%s2259_s1 + $0x2d4] ss:$8 sps:$4 sm:$0xff]  }
  0x33   :  { %1028 = vmatpush2.bf16.msra.mxu0 %v1571_v52  ;;  %v1657_v52 = vld [vmem:[%s2259_s1 + $0x2d0] ss:$8 sps:$4 sm:$0xff]  }
  0x34   :  { %1081 = vmatpush2.bf16.msra.mxu1 %v1572_v53  ;;  %1029 = vmatprep.subr.bf16.mxu0 %v1573_v54  ;;  %v1660_v53 = vld [vmem:[%s2259_s1 + $0x3d0] ss:$8 sps:$4 sm:$0xff]   ;;  %v1665_v54 = vld [vmem:[%s2259_s1 + $0x2c4] ss:$8 sps:$4 sm:$0xff]  }
  0x35   :  { %1082 = vmatprep.subr.bf16.mxu1 %v1575_v55  ;;  %v1668_v55 = vld [vmem:[%s2259_s1 + $0x3c4] ss:$8 sps:$4 sm:$0xff]  }
  0x37   :  { %1030 = vmatpush2.bf16.msra.mxu0 %v1577_v56  ;;  %v1663_v56 = vld [vmem:[%s2259_s1 + $0x2c0] ss:$8 sps:$4 sm:$0xff]  }
  0x38   :  { %1083 = vmatpush2.bf16.msra.mxu1 %v1578_v57  ;;  %1031 = vmatprep.subr.bf16.mxu0 %v1579_v58  ;;  %v1666_v57 = vld [vmem:[%s2259_s1 + $0x3c0] ss:$8 sps:$4 sm:$0xff]   ;;  %v1673_v58 = vld [vmem:[%s2259_s1 + $0x2b4] ss:$8 sps:$4 sm:$0xff]  }
  0x39   :  { %1084 = vmatprep.subr.bf16.mxu1 %v1581_v59  ;;  %v1676_v59 = vld [vmem:[%s2259_s1 + $0x3b4] ss:$8 sps:$4 sm:$0xff]  }
  0x3b   :  { %1032 = vmatpush2.bf16.msra.mxu0 %v1583_v60  ;;  %v1671_v60 = vld [vmem:[%s2259_s1 + $0x2b0] ss:$8 sps:$4 sm:$0xff]  }
  0x3c   :  { %1085 = vmatpush2.bf16.msra.mxu1 %v1584_v61  ;;  %1033 = vmatprep.subr.bf16.mxu0 %v1585_v62  ;;  %v1674_v61 = vld [vmem:[%s2259_s1 + $0x3b0] ss:$8 sps:$4 sm:$0xff]   ;;  %v1683_v62 = vld [vmem:[%s2259_s1 + $0x2a4] ss:$8 sps:$4 sm:$0xff]  }
  0x3d   :  { %1086 = vmatprep.subr.bf16.mxu1 %v1587_v63  ;;  %v1686_v63 = vld [vmem:[%s2259_s1 + $0x3a4] ss:$8 sps:$4 sm:$0xff]  }
  0x3f   :  { %1034 = vmatpush2.bf16.msra.mxu0 %v1589_v0  ;;  %v1681_v0 = vld [vmem:[%s2259_s1 + $0x2a0] ss:$8 sps:$4 sm:$0xff]  }
  0x40   :  { %1087 = vmatpush2.bf16.msra.mxu1 %v1590_v1  ;;  %1109 = vmatprep.subr.bf16.mxu0 %v1599_v2  ;;  %v1684_v1 = vld [vmem:[%s2259_s1 + $0x3a0] ss:$8 sps:$4 sm:$0xff]   ;;  %v1689_v2 = vld [vmem:[%s2259_s1 + $0x294] ss:$8 sps:$4 sm:$0xff]  }
  0x41   :  { %1162 = vmatprep.subr.bf16.mxu1 %v1602_v3  ;;  %v1692_v3 = vld [vmem:[%s2259_s1 + $0x394] ss:$8 sps:$4 sm:$0xff]  }
  0x42   :  { %1036 = vmatmul.mubr.bf16.vlgmr.msra.gmra.mxu0 %v1591_v4  ;;  %v1687_v4 = vld [vmem:[%s2259_s1 + $0x290] ss:$8 sps:$4 sm:$0xff]  }
  0x43   :  { %1089 = vmatmul.mubr.bf16.vlgmr.msra.gmra.mxu1 %v1594_v5  ;;  %1110 = vmatpush1.bf16.msra.mxu0 %v1597_v6  ;;  %v1690_v5 = vld [vmem:[%s2259_s1 + $0x390] ss:$8 sps:$4 sm:$0xff]   ;;  %v1695_v6 = vld [vmem:[%s2259_s1 + $0x284] ss:$8 sps:$4 sm:$0xff]  }
  0x44   :  { %1163 = vmatpush1.bf16.msra.mxu1 %v1600_v7  ;;  %1111 = vmatprep.subr.bf16.mxu0 %v1605_v8  ;;  %v1698_v7 = vld [vmem:[%s2259_s1 + $0x384] ss:$8 sps:$4 sm:$0xff]   ;;  %v1693_v8 = vld [vmem:[%s2259_s1 + $0x280] ss:$8 sps:$4 sm:$0xff]  }
  0x45   :  { %1164 = vmatprep.subr.bf16.mxu1 %v1608_v9  ;;  %1045 = vmatprep.mubr.bf16.mxu0 %v1669_v22  ;;  %v1696_v9 = vld [vmem:[%s2259_s1 + $0x380] ss:$8 sps:$4 sm:$0xff]   ;;  %v1722_v22 = vld [vmem:[%s2259_s1 + $0x444] ss:$8 sps:$4 sm:$0xff]  }
  0x46   :  { %1098 = vmatprep.mubr.bf16.mxu1 %v1678_v29  ;;  %v1731_v29 = vld [vmem:[%s2259_s1 + $0x414] ss:$8 sps:$4 sm:$0xff]  }
  0x47   :  { %1112 = vmatpush1.bf16.msra.mxu0 %v1603_v10  ;;  %v1707_v10 = vld [vmem:[%s2259_s1 + $0x474] ss:$8 sps:$4 sm:$0xff]  }
  0x48   :  { %1165 = vmatpush1.bf16.msra.mxu1 %v1606_v11  ;;  %1113 = vmatprep.subr.bf16.mxu0 %v1611_v12  ;;  %v1699_v11 = vld [vmem:[%s2260_s0 + $0x10] ss:$36 sps:$4 sm:$0xff]   ;;  %v1702_v12 = vld [vmem:[%s2260_s0 + $0x18] ss:$36 sps:$4 sm:$0xff]  }
  0x49   :  { %1166 = vmatprep.subr.bf16.mxu1 %v1614_v13  ;;  %v1705_v13 = vld [vmem:[%s2259_s1 + $0x470] ss:$8 sps:$4 sm:$0xff]  }
  0x4a   :  { %1046 = vmatmul.mubr.bf16.gmra.mxu0 %v1677_v27  ;;  %v1728_v27 = vld [vmem:[%s2259_s1 + $0x424] ss:$8 sps:$4 sm:$0xff]  }
  0x4b   :  { %1114 = vmatpush1.bf16.msra.mxu0 %v1609_v14  ;;  %1099 = vmatmul.mubr.bf16.gmra.mxu1 %v1680_v31  ;;  %v1710_v14 = vld [vmem:[%s2259_s1 + $0x464] ss:$8 sps:$4 sm:$0xff]  }
  0x4c   :  { %1167 = vmatpush1.bf16.msra.mxu1 %v1612_v15  ;;  %1115 = vmatprep.subr.bf16.mxu0 %v1617_v16  ;;  %v1711_v15 = vld [vmem:[%s2260_s0 + $0x5c] ss:$36 sps:$4 sm:$0xff]   ;;  %v1717_v16 = vld [vmem:[%s2260_s0 + $0x64] ss:$36 sps:$4 sm:$0xff]  }
  0x4d   :  { %1168 = vmatprep.subr.bf16.mxu1 %v1620_v17  ;;  %1141 = vmatprep.mubr.bf16.mxu0 %v1701_v41  ;;  %v1708_v17 = vld [vmem:[%s2259_s1 + $0x460] ss:$8 sps:$4 sm:$0xff]   ;;  %v1734_v31 = vld [vmem:[%s2259_s1 + $0x404] ss:$8 sps:$4 sm:$0xff]  }
  0x4e   :  { %1194 = vmatprep.mubr.bf16.mxu1 %v1704_v43 }
  0x4f   :  { %1116 = vmatpush1.bf16.msra.mxu0 %v1615_v18  ;;  %v1716_v18 = vld [vmem:[%s2259_s1 + $0x454] ss:$8 sps:$4 sm:$0xff]  }
  0x50   :  { %1169 = vmatpush1.bf16.msra.mxu1 %v1618_v19  ;;  %1117 = vmatprep.subr.bf16.mxu0 %v1623_v20  ;;  %v1713_v19 = vld [vmem:[%s2260_s0 + $0x58] ss:$36 sps:$4 sm:$0xff]   ;;  %v1719_v20 = vld [vmem:[%s2260_s0 + $0x60] ss:$36 sps:$4 sm:$0xff]  }
  0x51   :  { %1170 = vmatprep.subr.bf16.mxu1 %v1626_v21  ;;  %v1714_v21 = vld [vmem:[%s2259_s1 + $0x450] ss:$8 sps:$4 sm:$0xff]  }
  0x53   :  { %1118 = vmatpush1.bf16.msra.mxu0 %v1621_v23  ;;  %v1720_v23 = vld [vmem:[%s2259_s1 + $0x440] ss:$8 sps:$4 sm:$0xff]  }
  0x54   :  { %1171 = vmatpush1.bf16.msra.mxu1 %v1624_v24  ;;  %1119 = vmatprep.subr.bf16.mxu0 %v1629_v25  ;;  %v1725_v24 = vld [vmem:[%s2259_s1 + $0x434] ss:$8 sps:$4 sm:$0xff]   ;;  %v1737_v25 = vmov 0  }
  0x55   :  { %1172 = vmatprep.subr.bf16.mxu1 %v1632_v26  ;;  %v1723_v26 = vld [vmem:[%s2259_s1 + $0x430] ss:$8 sps:$4 sm:$0xff]  }
  0x57   :  { %1120 = vmatpush1.bf16.msra.mxu0 %v1627_v28  ;;  %v1726_v28 = vld [vmem:[%s2259_s1 + $0x420] ss:$8 sps:$4 sm:$0xff]  }
  0x58   :  { %1173 = vmatpush1.bf16.msra.mxu1 %v1630_v30  ;;  %1121 = vmatprep.subr.bf16.mxu0 %v1635_v32  ;;  %v1729_v30 = vld [vmem:[%s2259_s1 + $0x410] ss:$8 sps:$4 sm:$0xff]   ;;  %v1732_v32 = vld [vmem:[%s2259_s1 + $0x400] ss:$8 sps:$4 sm:$0xff]  }
  0x59   :  { %1174 = vmatprep.subr.bf16.mxu1 %v1638_v33  ;;  %v1735_v33 = vld [vmem:[%s2260_s0 + $0x20] ss:$36 sps:$4 sm:$0xff]  }
  0x5b   :  { %1122 = vmatpush1.bf16.msra.mxu0 %v1633_v34  ;;  %v1736_v34 = vld [vmem:[%s2260_s0 + $0x68] ss:$36 sps:$4 sm:$0xff]  }
  0x5c   :  { %1175 = vmatpush1.bf16.msra.mxu1 %v1636_v35  ;;  %1123 = vmatprep.subr.bf16.mxu0 %v1641_v36 }
  0x5d   :  { %1176 = vmatprep.subr.bf16.mxu1 %v1644_v37 }
  0x5f   :  { %1124 = vmatpush1.bf16.msra.mxu0 %v1639_v38 }
  0x60   :  { %1177 = vmatpush1.bf16.msra.mxu1 %v1642_v39  ;;  %1125 = vmatprep.subr.bf16.mxu0 %v1647_v40 }
  0x61   :  { %1178 = vmatprep.subr.bf16.mxu1 %v1650_v42 }
  0x63   :  { %1126 = vmatpush2.bf16.msra.mxu0 %v1645_v44 }
  0x64   :  { %1179 = vmatpush2.bf16.msra.mxu1 %v1648_v45  ;;  %1127 = vmatprep.subr.bf16.mxu0 %v1653_v46 }
  0x65   :  { %1180 = vmatprep.subr.bf16.mxu1 %v1656_v47 }
  0x67   :  { %1128 = vmatpush2.bf16.msra.mxu0 %v1651_v48 }
  0x68   :  { %1181 = vmatpush2.bf16.msra.mxu1 %v1654_v49  ;;  %1129 = vmatprep.subr.bf16.mxu0 %v1659_v50 }
  0x69   :  { %1182 = vmatprep.subr.bf16.mxu1 %v1662_v51 }
  0x6b   :  { %1130 = vmatpush2.bf16.msra.mxu0 %v1657_v52 }
  0x6c   :  { %1183 = vmatpush2.bf16.msra.mxu1 %v1660_v53  ;;  %1131 = vmatprep.subr.bf16.mxu0 %v1665_v54  ;;  %v181_v53 = vlaneseq }
  0x6d   :  { %1184 = vmatprep.subr.bf16.mxu1 %v1668_v55 }
  0x6f   :  { %1132 = vmatpush2.bf16.msra.mxu0 %v1663_v56  ;;  %v182_v56 = vshrl.u32 %v181_v53, 7 }
  0x70   :  { %1185 = vmatpush2.bf16.msra.mxu1 %v1666_v57  ;;  %1133 = vmatprep.subr.bf16.mxu0 %v1673_v58 }
  0x71   :  { %1186 = vmatprep.subr.bf16.mxu1 %v1676_v59  ;;  %v183_v59 = vsub.s32 0, %v182_v56 }
  0x73   :  { %1134 = vmatpush2.bf16.msra.mxu0 %v1671_v60  ;;  %v179_v60 = vld [vmem:[%s2261_s2] sm:$0x3] }
  0x74   :  { %1187 = vmatpush2.bf16.msra.mxu1 %v1674_v61  ;;  %1135 = vmatprep.subr.bf16.mxu0 %v1683_v62  ;;  %v187_v62 = vsub.s32 1, %v182_v56 }
  0x75   :  { %1188 = vmatprep.subr.bf16.mxu1 %v1686_v63 }
  0x77   :  { %1136 = vmatpush2.bf16.msra.mxu0 %v1681_v0  ;;  %v184_v0 = vrot.slane %v179_v60, %v183_v59 }
  0x78   :  { %1189 = vmatpush2.bf16.msra.mxu1 %v1684_v1  ;;  %1137 = vmatprep.subr.bf16.mxu0 %v1689_v2 }
  0x79   :  { %1190 = vmatprep.subr.bf16.mxu1 %v1692_v3  ;;  %v188_v3 = vrot.slane %v179_v60, %v187_v62 }
  0x7b   :  { %1138 = vmatpush2.bf16.msra.mxu0 %v1687_v4 }
  0x7c   :  { %1191 = vmatpush2.bf16.msra.mxu1 %v1690_v5  ;;  %1139 = vmatprep.subr.bf16.mxu0 %v1695_v6 }
  0x7d   :  { %1192 = vmatprep.subr.bf16.mxu1 %v1698_v7 }
  0x7f   :  { %1140 = vmatpush2.bf16.msra.mxu0 %v1693_v8 }
  0x80   :  { %1193 = vmatpush2.bf16.msra.mxu1 %v1696_v9  ;;  %1215 = vmatprep.subr.bf16.mxu0 %v1707_v10 }
  0x81   :  { %1478 = vmatprep.subr.bf16.mxu1 %v1707_v10 }
  0x82   :  { %1142 = vmatmul.mubr.bf16.vlgmr.msra.gmra.mxu0 %v1699_v11 }
  0x83   :  { %1195 = vmatmul.mubr.bf16.vlgmr.msra.gmra.mxu1 %v1702_v12  ;;  %1216 = vmatpush1.bf16.msra.mxu0 %v1705_v13 }
  0x84   :  { %1486 = vmatpush1.bf16.msra.mxu1 %v1705_v13  ;;  %1217 = vmatprep.subr.bf16.mxu0 %v1710_v14 }
  0x85   :  { %1479 = vmatprep.subr.bf16.mxu1 %v1710_v14  ;;  %1151 = vmatprep.mubr.bf16.mxu0 %v1711_v15 }
  0x86   :  { %1204 = vmatprep.mubr.bf16.mxu1 %v1717_v16 }
  0x87   :  { %1218 = vmatpush1.bf16.msra.mxu0 %v1708_v17 }
  0x88   :  { %1487 = vmatpush1.bf16.msra.mxu1 %v1708_v17  ;;  %1219 = vmatprep.subr.bf16.mxu0 %v1716_v18 }
  0x89   :  { %1480 = vmatprep.subr.bf16.mxu1 %v1716_v18 }
  0x8a   :  { %1152 = vmatmul.mubr.bf16.gmra.mxu0 %v1713_v19 }
  0x8b   :  { %1205 = vmatmul.mubr.bf16.gmra.mxu1 %v1719_v20  ;;  %1220 = vmatpush1.bf16.msra.mxu0 %v1714_v21 }
  0x8c   :  { %1488 = vmatpush1.bf16.msra.mxu1 %v1714_v21  ;;  %1221 = vmatprep.subr.bf16.mxu0 %v1722_v22 }
  0x8d   :  { %1481 = vmatprep.subr.bf16.mxu1 %v1722_v22  ;;  %1247 = vmatprep.mubr.bf16.mxu0 %v1737_v25 }
  0x8e   :  { %1257 = vmatprep.mubr.bf16.mxu1 %v1737_v25 }
  0x8f   :  { %1222 = vmatpush1.bf16.msra.mxu0 %v1720_v23 }
  0x90   :  { %1489 = vmatpush1.bf16.msra.mxu1 %v1720_v23  ;;  %1223 = vmatprep.subr.bf16.mxu0 %v1725_v24 }
  0x91   :  { %1482 = vmatprep.subr.bf16.mxu1 %v1725_v24 }
  0x93   :  { %1224 = vmatpush1.bf16.msra.mxu0 %v1723_v26 }
  0x94   :  { %1490 = vmatpush1.bf16.msra.mxu1 %v1723_v26  ;;  %1225 = vmatprep.subr.bf16.mxu0 %v1728_v27 }
  0x95   :  { %1483 = vmatprep.subr.bf16.mxu1 %v1728_v27 }
  0x97   :  { %1226 = vmatpush1.bf16.msra.mxu0 %v1726_v28 }
  0x98   :  { %1491 = vmatpush1.bf16.msra.mxu1 %v1726_v28  ;;  %1227 = vmatprep.subr.bf16.mxu0 %v1731_v29 }
  0x99   :  { %1484 = vmatprep.subr.bf16.mxu1 %v1731_v29 }
  0x9b   :  { %1228 = vmatpush1.bf16.msra.mxu0 %v1729_v30 }
  0x9c   :  { %1492 = vmatpush1.bf16.msra.mxu1 %v1729_v30  ;;  %1229 = vmatprep.subr.bf16.mxu0 %v1734_v31 }
  0x9d   :  { %1485 = vmatprep.subr.bf16.mxu1 %v1734_v31 }
  0x9f   :  { %1230 = vmatpush1.bf16.msra.mxu0 %v1732_v32 }
  0xa0   :  { %1493 = vmatpush1.bf16.msra.mxu1 %v1732_v32 }
  0xa2   :  { %1248 = vmatmul.mubr.bf16.vlgmr.msra.gmra.mxu0 %v1735_v33 }
  0xa3   :  { %1258 = vmatmul.mubr.bf16.vlgmr.msra.gmra.mxu1 %v1736_v34 }
 0x102   :  { %v1037_v35 = vpop.f32.mrf.mxu0 }
 0x103   :  { %v1090_v36 = vpop.f32.mrf.mxu1  ;;  %v1038_v4 = vadd.f32 %v1037_v35, %v184_v0 }
 0x104   :  { %v1039_v37 = vpop.f32.mrf.mxu0 }
 0x105   :  { %v1092_v38 = vpop.f32.mrf.mxu1  ;;  %v1040_v8 = vadd.f32 %v1039_v37, %v188_v3  ;;  %v1091_v10 = vadd.f32 %v1090_v36, %v1038_v4 }
 0x106   :  { %v1041_v39 = vpop.f32.mrf.mxu0 }
 0x107   :  { %v1094_v40 = vpop.f32.mrf.mxu1  ;;  %v1042_v12 = vadd.f32 %v1041_v39, %v184_v0  ;;  %v1093_v16 = vadd.f32 %v1092_v38, %v1040_v8 }
 0x108   :  { %v1043_v41 = vpop.f32.mrf.mxu0 }
 0x109   :  { %v1096_v42 = vpop.f32.mrf.mxu1  ;;  %v1044_v20 = vadd.f32 %v1043_v41, %v188_v3  ;;  %v1095_v24 = vadd.f32 %v1094_v40, %v1042_v12 }
 0x10a   :  { %v1047_v43 = vpop.f32.mrf.mxu0 }
 0x10b   :  { %v1100_v44 = vpop.f32.mrf.mxu1  ;;  %v1048_v5 = vadd.f32 %v1047_v43, %v184_v0  ;;  %v1097_v30 = vadd.f32 %v1096_v42, %v1044_v20 }
 0x10c   :  { %v1049_v45 = vpop.f32.mrf.mxu0 }
 0x10d   :  { %v1102_v46 = vpop.f32.mrf.mxu1  ;;  %v1050_v9 = vadd.f32 %v1049_v45, %v188_v3  ;;  %v1101_v11 = vadd.f32 %v1100_v44, %v1048_v5 }
 0x10e   :  { %v1051_v47 = vpop.f32.mrf.mxu0 }
 0x10f   :  { %v1104_v48 = vpop.f32.mrf.mxu1  ;;  %v1052_v13 = vadd.f32 %v1051_v47, %v184_v0  ;;  %v1103_v17 = vadd.f32 %v1102_v46, %v1050_v9 }
 0x110   :  { %v1053_v49 = vpop.f32.mrf.mxu0 }
 0x111   :  { %v1106_v50 = vpop.f32.mrf.mxu1  ;;  %v1054_v21 = vadd.f32 %v1053_v49, %v188_v3  ;;  %v1105_v25 = vadd.f32 %v1104_v48, %v1052_v13 }
 0x113   :  { %v1107_v31 = vadd.f32 %v1106_v50, %v1054_v21 }
 0x142   :  { %v1143_v51 = vpop.f32.mrf.mxu0 }
 0x143   :  { %v1196_v52 = vpop.f32.mrf.mxu1  ;;  %v1144_v18 = vadd.f32 %v1143_v51, %v1091_v10 }
 0x144   :  { %v1145_v54 = vpop.f32.mrf.mxu0 }
 0x145   :  { %v1198_v55 = vpop.f32.mrf.mxu1  ;;  %v1146_v22 = vadd.f32 %v1145_v54, %v1093_v16  ;;  %v1197_v28 = vadd.f32 %v1196_v52, %v1144_v18 }
 0x146   :  { %v1147_v57 = vpop.f32.mrf.mxu0 }
 0x147   :  { %v1200_v58 = vpop.f32.mrf.mxu1  ;;  %v1148_v32 = vadd.f32 %v1147_v57, %v1095_v24  ;;  %v1199_v36 = vadd.f32 %v1198_v55, %v1146_v22 }
 0x148   :  { %v1149_v61 = vpop.f32.mrf.mxu0 }
 0x149   :  { %v1202_v63 = vpop.f32.mrf.mxu1  ;;  %v1150_v41 = vadd.f32 %v1149_v61, %v1097_v30  ;;  %v1201_v47 = vadd.f32 %v1200_v58, %v1148_v32 }
 0x14a   :  { %v1153_v1 = vpop.f32.mrf.mxu0 }
 0x14b   :  { %v1206_v2 = vpop.f32.mrf.mxu1  ;;  %v1154_v19 = vadd.f32 %v1153_v1, %v1101_v11  ;;  %v1203_v54 = vadd.f32 %v1202_v63, %v1150_v41 }
 0x14c   :  { %v1155_v6 = vpop.f32.mrf.mxu0 }
 0x14d   :  { %v1208_v7 = vpop.f32.mrf.mxu1  ;;  %v1156_v23 = vadd.f32 %v1155_v6, %v1103_v17  ;;  %v1207_v29 = vadd.f32 %v1206_v2, %v1154_v19 }
 0x14e   :  { %v1157_v14 = vpop.f32.mrf.mxu0 }
 0x14f   :  { %v1210_v15 = vpop.f32.mrf.mxu1  ;;  %v1158_v33 = vadd.f32 %v1157_v14, %v1105_v25  ;;  %v1209_v37 = vadd.f32 %v1208_v7, %v1156_v23 }
 0x150   :  { %v1159_v26 = vpop.f32.mrf.mxu0 }
 0x151   :  { %v1212_v27 = vpop.f32.mrf.mxu1  ;;  %v1160_v43 = vadd.f32 %v1159_v26, %v1107_v31  ;;  %v1211_v48 = vadd.f32 %v1210_v15, %v1158_v33 }
 0x153   :  { %v1213_v56 = vadd.f32 %v1212_v27, %v1160_v43 }
 0x162   :  { %v1249_v34 = vpop.f32.mrf.mxu0 }
 0x163   :  { %v1259_v35 = vpop.f32.mrf.mxu1  ;;  %v1250_v38 = vadd.f32 %v1249_v34, %v1197_v28 }
 0x164   :  { %v1260_v39 = vadd.f32 %v1259_v35, %v1207_v29  ;;  %v1251_v44 = vpop.f32.mrf.mxu0 }
 0x165   :  { %v1261_v45 = vpop.f32.mrf.mxu1  ;;  %v1252_v40 = vadd.f32 %v1251_v44, %v1199_v36  ;;  %v1268_v42 = vmax.f32 %v1250_v38, 0.0 }
 0x166   :  { %v1262_v46 = vadd.f32 %v1261_v45, %v1209_v37  ;;  %v1253_v49 = vpop.f32.mrf.mxu0  ;;  %v1272_v50 = vmax.f32 %v1260_v39, 0.0 }
 0x167   :  { %v1263_v51 = vpop.f32.mrf.mxu1  ;;  %v1269_v52 = vmax.f32 %v1252_v40, 0.0  ;;  %v1254_v55 = vadd.f32 %v1253_v49, %v1201_v47 }
 0x168   :  { %v1273_v53 = vmax.f32 %v1262_v46, 0.0  ;;  %v1264_v57 = vadd.f32 %v1263_v51, %v1211_v48  ;;  %v1255_v59 = vpop.f32.mrf.mxu0 }
 0x169   :  { %v1265_v60 = vpop.f32.mrf.mxu1  ;;  %v1474_v61 = vpack.c.bf16 %v1269_v52, %v1268_v42  ;;  %v1256_v0 = vadd.f32 %v1255_v59, %v1203_v54  ;;  %v1270_v58 = vmax.f32 %v1254_v55, 0.0 }
 0x16a   :  { %v1476_v62 = vpack.c.bf16 %v1273_v53, %v1272_v50  ;;  %v1266_v1 = vadd.f32 %v1265_v60, %v1213_v56  ;;  %v1274_v2 = vmax.f32 %v1264_v57, 0.0 }
 0x16b   :  { %1300 = vst [vmem:[%s2262_s3] sm:$0xff] %v1474_v61  ;;  %v1271_v63 = vmax.f32 %v1256_v0, 0.0 }
 0x16c   :  { %1302 = vst [vmem:[%s2262_s3 + $0x10] sm:$0xff] %v1476_v62  ;;  %v1275_v3 = vmax.f32 %v1266_v1, 0.0 }
 0x16d   :  { %v1475_v4 = vpack.c.bf16 %v1271_v63, %v1270_v58 }
 0x16e   :  { %v1477_v5 = vpack.c.bf16 %v1275_v3, %v1274_v2 }
 0x16f   :  { %1301 = vst [vmem:[%s2262_s3 + $0x8] sm:$0xff] %v1475_v4 }
 0x170   :  { %1303 = vst [vmem:[%s2262_s3 + $0x18] sm:$0xff] %v1477_v5 }

// kernel: feature_net_forward.5
= control target key start
LH: loop header
LB: loop body
LE: loop exit
PB: predicated region body
PF: predicated region fallthrough
CT: control target
= control target key end

     0   :  { %10 = vsyncpa [#allocation4], 0  ;;  %s4827_s0 = inlined_call_operand.vmem [shape: bf16[2,8,2304], index: 0, kind: input, shape index: {}]   ;;  %s4828_s1 = inlined_call_operand.vmem [shape: bf16[2304,256], index: 1, kind: input, shape index: {}]   ;;  %s4829_s2 = inlined_call_operand.vmem [shape: f32[1,256], index: 2, kind: input, shape index: {}]   ;;  %s4830_s3 = inlined_call_operand.vmem [shape: f32[256,128], index: 3, kind: input, shape index: {}]   ;;  %s4831_s4 = inlined_call_operand.vmem [shape: f32[1,128], index: 4, kind: input, shape index: {}]   ;;  %s4832_s5 = inlined_call_operand.hbm [shape: f32[2,1,128], index: 5, kind: output, shape index: {}]  }
   0x1   :  { %12 = vsyncpa [#allocation4 + $0x1], 0  ;;  %s3667_s18 = smov 0   ;;  %s3669_s19 = smov 0  }
   0x2   :  { %s3671_s20 = smov 0   ;;  %s3673_s21 = smov 0  }
   0x3   :  { %s3675_s22 = smov 0   ;;  %s3677_s23 = smov 0  }
   0x4 LB: > { %s2694_s24 = sadd.s32 4294967295, %s3632_s23   ;;  %s2695_s25 = sadd.s32 4294967294, %s3632_s23   ;;  %s3632_s23 = sphi %s3677_s23, %s18_s23   ;;  %s3628_s22 = sphi %s3675_s22, %s4841_s22   ;;  %s3624_s21 = sphi %s3673_s21, %s4840_s21   ;;  %s3620_s20 = sphi %s3671_s20, %s4839_s20   ;;  %s3616_s19 = sphi %s3669_s19, %s4838_s19   ;;  %s3612_s18 = sphi %s3667_s18, %s4837_s18  }
   0x5   : > { %s30_s26 = sadd.s32 1, %s3628_s22  ;;  %s149_s27 = sadd.s32 1, %s3620_s20 }
   0x6   : > { %p32_p0 = scmp.ge.s32.totalorder %s30_s26, 2  ;;  %p159_p1 = scmp.ne.s32.totalorder %s3620_s20, %s3616_s19 }
   0x7   : > { %p160_p2 = scmp.eq.s32.totalorder %s2694_s24, 1  ;;  %p165_p3 = scmp.ne.s32.totalorder %s3616_s19, %s3612_s18 }
   0x8   : > { %s4843_s26 = smov (%p32_p0, %s30_s26), 0  ;;  %p166_p5 = scmp.eq.s32.totalorder %s2695_s25, 1 }
   0x9   : > { %p3707_p4 = por %p160_p2, %p159_p1  ;;  %s146_s29 = ssub.s32 %s3628_s22, %s4843_s26 }
   0xa   : > { %p2698_p6 = scmp.ge.s32.totalorder %s3632_s23, 1  ;;  %p147_p7 = scmp.eq.s32.totalorder %s146_s29, 0 }
   0xb   : > { %p3714_p8 = por %p166_p5, %p165_p3  ;;  %p208_p9 = scmp.lt.s32.totalorder %s3632_s23, 3 }
   0xc   : > { %s3720_s6 = scalar_select %p147_p7, %s3620_s20, %s149_s27  }
   0xd   : > { %p209_p10 = pnand %p2698_p6, %p208_p9 }
   0xe   : > { %p239_p11 = scmp.lt.s32.totalorder (!%p209_p10), %s3624_s21, 1  ;;  %s237_s12 = sand.u32 (!%p209_p10), 1, %s3616_s19  }
   0xf   : > { %212 = sbr.rel (%p209_p10) target bundleno = 814 (0x32e), region = 40  ;;  %s3006_s13 = sshll.u32 (!%p209_p10), %s3624_s21, 4 }
  0x10   : > { %s238_s14 = scalar_lea.vmem (!%p209_p10), [#allocation3], %s237_s12  ;;  %s4787_s24 = scalar_lea.hbm (!%p209_p10), %s4832_s5, %s3006_s13 }
  0x11   : > { %s2610_s25 = scalar_lea.sflag (!%p209_p10), [#allocation4], %s237_s12 }
  0x14   : > { %v3102_v0 = vld [vmem:[%s4828_s1 + $0x74] ss:$8 sps:$4 sm:$0xff]   ;;  %v3104_v1 = vld [vmem:[%s4828_s1 + $0x70] ss:$8 sps:$4 sm:$0xff]   ;;  %v3108_v4 = vld [vmem:[%s4828_s1 + $0x64] ss:$8 sps:$4 sm:$0xff]  }
  0x15   : > { %2069 = vmatprep.subr.bf16.mxu0 %v3102_v0  ;;  %v3105_v2 = vld [vmem:[%s4828_s1 + $0x174] ss:$8 sps:$4 sm:$0xff]   ;;  %v3107_v3 = vld [vmem:[%s4828_s1 + $0x170] ss:$8 sps:$4 sm:$0xff]   ;;  %v3110_v5 = vld [vmem:[%s4828_s1 + $0x60] ss:$8 sps:$4 sm:$0xff]  }
  0x16   : > { %2070 = vmatpush1.bf16.msra.mxu0 %v3104_v1  ;;  %2110 = vmatprep.subr.bf16.mxu1 %v3105_v2  ;;  %v3111_v6 = vld [vmem:[%s4828_s1 + $0x164] ss:$8 sps:$4 sm:$0xff]   ;;  %v3113_v7 = vld [vmem:[%s4828_s1 + $0x160] ss:$8 sps:$4 sm:$0xff]   ;;  %v3114_v8 = vld [vmem:[%s4828_s1 + $0x54] ss:$8 sps:$4 sm:$0xff]  }
  0x17   : > { %2111 = vmatpush1.bf16.msra.mxu1 %v3107_v3  ;;  %2071 = vmatprep.subr.bf16.mxu0 %v3108_v4  ;;  %v3116_v9 = vld [vmem:[%s4828_s1 + $0x50] ss:$8 sps:$4 sm:$0xff]   ;;  %v3117_v10 = vld [vmem:[%s4828_s1 + $0x154] ss:$8 sps:$4 sm:$0xff]   ;;  %v3120_v11 = vld [vmem:[%s4828_s1 + $0x44] ss:$8 sps:$4 sm:$0xff]  }
  0x18   : > { %2112 = vmatprep.subr.bf16.mxu1 %v3111_v6  ;;  %v3119_v12 = vld [vmem:[%s4828_s1 + $0x150] ss:$8 sps:$4 sm:$0xff]   ;;  %v3123_v13 = vld [vmem:[%s4828_s1 + $0x144] ss:$8 sps:$4 sm:$0xff]   ;;  %v3122_v14 = vld [vmem:[%s4828_s1 + $0x40] ss:$8 sps:$4 sm:$0xff]  }
  0x19   : > { %v3126_v15 = vld [vmem:[%s4828_s1 + $0x34] ss:$8 sps:$4 sm:$0xff]   ;;  %v3125_v16 = vld [vmem:[%s4828_s1 + $0x140] ss:$8 sps:$4 sm:$0xff]   ;;  %v3128_v18 = vld [vmem:[%s4828_s1 + $0x30] ss:$8 sps:$4 sm:$0xff]  }
  0x1a   : > { %2072 = vmatpush1.bf16.msra.mxu0 %v3110_v5  ;;  %v3129_v17 = vld [vmem:[%s4828_s1 + $0x134] ss:$8 sps:$4 sm:$0xff]   ;;  %v3132_v19 = vld [vmem:[%s4828_s1 + $0x24] ss:$8 sps:$4 sm:$0xff]   ;;  %v3131_v20 = vld [vmem:[%s4828_s1 + $0x130] ss:$8 sps:$4 sm:$0xff]  }
  0x1b   : > { %2073 = vmatprep.subr.bf16.mxu0 %v3114_v8  ;;  %2113 = vmatpush1.bf16.msra.mxu1 %v3113_v7  ;;  %v3135_v21 = vld [vmem:[%s4828_s1 + $0x124] ss:$8 sps:$4 sm:$0xff]   ;;  %v3134_v22 = vld [vmem:[%s4828_s1 + $0x20] ss:$8 sps:$4 sm:$0xff]   ;;  %v3138_v23 = vld [vmem:[%s4828_s1 + $0x14] ss:$8 sps:$4 sm:$0xff]  }
  0x1c   : > { %2114 = vmatprep.subr.bf16.mxu1 %v3117_v10  ;;  %v3137_v24 = vld [vmem:[%s4828_s1 + $0x120] ss:$8 sps:$4 sm:$0xff]   ;;  %v3141_v25 = vld [vmem:[%s4828_s1 + $0x114] ss:$8 sps:$4 sm:$0xff]   ;;  %v3140_v26 = vld [vmem:[%s4828_s1 + $0x10] ss:$8 sps:$4 sm:$0xff]  }
  0x1d   : > { %v3144_v27 = vld [vmem:[%s4828_s1 + $0x4] ss:$8 sps:$4 sm:$0xff]   ;;  %v3143_v28 = vld [vmem:[%s4828_s1 + $0x110] ss:$8 sps:$4 sm:$0xff]   ;;  %v3146_v30 = vld [vmem:[%s4828_s1] ss:$8 sps:$4 sm:$0xff]  }
  0x1e   : > { %2074 = vmatpush1.bf16.msra.mxu0 %v3116_v9  ;;  %v3147_v29 = vld [vmem:[%s4828_s1 + $0x104] ss:$8 sps:$4 sm:$0xff]   ;;  %v3150_v31 = vld [vmem:[%s4828_s1 + $0xf4] ss:$8 sps:$4 sm:$0xff]   ;;  %v3149_v32 = vld [vmem:[%s4828_s1 + $0x100] ss:$8 sps:$4 sm:$0xff]  }
  0x1f   : > { %2075 = vmatprep.subr.bf16.mxu0 %v3120_v11  ;;  %2115 = vmatpush1.bf16.msra.mxu1 %v3119_v12  ;;  %v3153_v33 = vld [vmem:[%s4828_s1 + $0x1f4] ss:$8 sps:$4 sm:$0xff]   ;;  %v3152_v34 = vld [vmem:[%s4828_s1 + $0xf0] ss:$8 sps:$4 sm:$0xff]   ;;  %s240_s17 = scalar_select %p239_p11, %s3624_s21, 1 }
  0x20   : > { %2116 = vmatprep.subr.bf16.mxu1 %v3123_v13  ;;  %v3156_v35 = vld [vmem:[%s4828_s1 + $0xe4] ss:$8 sps:$4 sm:$0xff]   ;;  %v3155_v36 = vld [vmem:[%s4828_s1 + $0x1f0] ss:$8 sps:$4 sm:$0xff]   ;;  %v3158_v38 = vld [vmem:[%s4828_s1 + $0xe0] ss:$8 sps:$4 sm:$0xff]  }
  0x21   : > { %v3159_v37 = vld [vmem:[%s4828_s1 + $0x1e4] ss:$8 sps:$4 sm:$0xff]   ;;  %s3044_s11 = smul.u32 72, %s240_s17  ;;  %v3162_v39 = vld [vmem:[%s4828_s1 + $0xd4] ss:$8 sps:$4 sm:$0xff]  }
  0x22   : > { %2076 = vmatpush1.bf16.msra.mxu0 %v3122_v14  ;;  %v3161_v40 = vld [vmem:[%s4828_s1 + $0x1e0] ss:$8 sps:$4 sm:$0xff]   ;;  %v3165_v41 = vld [vmem:[%s4828_s1 + $0x1d4] ss:$8 sps:$4 sm:$0xff]   ;;  %v3164_v42 = vld [vmem:[%s4828_s1 + $0xd0] ss:$8 sps:$4 sm:$0xff]  }
  0x23   : > { %2077 = vmatprep.subr.bf16.mxu0 %v3126_v15  ;;  %2117 = vmatpush1.bf16.msra.mxu1 %v3125_v16  ;;  %s3856_s7 = scalar_lea.vmem %s4827_s0, %s3044_s11  ;;  %v3168_v43 = vld [vmem:[%s4828_s1 + $0xc4] ss:$8 sps:$4 sm:$0xff]   ;;  %v3167_v44 = vld [vmem:[%s4828_s1 + $0x1d0] ss:$8 sps:$4 sm:$0xff]   ;;  %v3170_v47 = vld [vmem:[%s4828_s1 + $0xc0] ss:$8 sps:$4 sm:$0xff]  }
  0x24   : > { %2118 = vmatprep.subr.bf16.mxu1 %v3129_v17  ;;  %v3171_v45 = vld [vmem:[%s4828_s1 + $0x1c4] ss:$8 sps:$4 sm:$0xff]   ;;  %v3174_v49 = vld [vmem:[%s4828_s1 + $0xb4] ss:$8 sps:$4 sm:$0xff]   ;;  %v3173_v51 = vld [vmem:[%s4828_s1 + $0x1c0] ss:$8 sps:$4 sm:$0xff]  }
  0x25   : > { %v257_v46 = vld [vmem:[%s3856_s7] sm:$0xff]  ;;  %v258_v50 = vld [vmem:[%s3856_s7 + $0x8] sm:$0xff]  ;;  %v3177_v53 = vld [vmem:[%s4828_s1 + $0x1b4] ss:$8 sps:$4 sm:$0xff]   ;;  %s2622_s11 = sshll.u32 %s238_s14, 4  ;;  %s2623_s11 = int_to_ptr.vmem [resolvable:$true] %s2622_s11 }
  0x26   : > { %2078 = vmatpush1.bf16.msra.mxu0 %v3128_v18  ;;  %v2701_v48 = vcombine.high %v257_v46, %v257_v46  ;;  %v2703_v52 = vcombine.high %v258_v50, %v258_v50  ;;  %v3176_v54 = vld [vmem:[%s4828_s1 + $0xb0] ss:$8 sps:$4 sm:$0xff]   ;;  %v3180_v55 = vld [vmem:[%s4828_s1 + $0xa4] ss:$8 sps:$4 sm:$0xff]   ;;  %v3182_v58 = vld [vmem:[%s4828_s1 + $0xa0] ss:$8 sps:$4 sm:$0xff]   ;;  %v2700_v5 = vcombine.low %v257_v46, %v257_v46  ;;  %v2702_v8 = vcombine.low %v258_v50, %v258_v50 }
  0x27   : > { %2079 = vmatprep.subr.bf16.mxu0 %v3132_v19  ;;  %2119 = vmatpush1.bf16.msra.mxu1 %v3131_v20  ;;  %v3179_v56 = vld [vmem:[%s4828_s1 + $0x1b0] ss:$8 sps:$4 sm:$0xff]   ;;  %v3183_v57 = vld [vmem:[%s4828_s1 + $0x1a4] ss:$8 sps:$4 sm:$0xff]   ;;  %v3186_v59 = vld [vmem:[%s4828_s1 + $0x94] ss:$8 sps:$4 sm:$0xff]  }
  0x28   : > { %2120 = vmatprep.subr.bf16.mxu1 %v3135_v21  ;;  %2101 = vmatprep.mubr.bf16.mxu0 %v2701_v48  ;;  %v3185_v60 = vld [vmem:[%s4828_s1 + $0x1a0] ss:$8 sps:$4 sm:$0xff]   ;;  %v3189_v61 = vld [vmem:[%s4828_s1 + $0x194] ss:$8 sps:$4 sm:$0xff]   ;;  %v3188_v62 = vld [vmem:[%s4828_s1 + $0x90] ss:$8 sps:$4 sm:$0xff]  }
  0x29   : > { %2142 = vmatprep.mubr.bf16.mxu1 %v2703_v52  ;;  %v3192_v63 = vld [vmem:[%s4828_s1 + $0x84] ss:$8 sps:$4 sm:$0xff]   ;;  %v3191_v0 = vld [vmem:[%s4828_s1 + $0x190] ss:$8 sps:$4 sm:$0xff]   ;;  %v3194_v2 = vld [vmem:[%s4828_s1 + $0x80] ss:$8 sps:$4 sm:$0xff]  }
  0x2a   : > { %2080 = vmatpush1.bf16.msra.mxu0 %v3134_v22  ;;  %v3195_v1 = vld [vmem:[%s4828_s1 + $0x184] ss:$8 sps:$4 sm:$0xff]   ;;  %v3202_v3 = vld [vmem:[%s4828_s1 + $0x274] ss:$8 sps:$4 sm:$0xff]   ;;  %v3199_v4 = vld [vmem:[%s4828_s1 + $0x180] ss:$8 sps:$4 sm:$0xff]  }
  0x2b   : > { %2081 = vmatprep.subr.bf16.mxu0 %v3138_v23  ;;  %2121 = vmatpush1.bf16.msra.mxu1 %v3137_v24  ;;  %v3207_v6 = vld [vmem:[%s4828_s1 + $0x374] ss:$8 sps:$4 sm:$0xff]   ;;  %v3200_v7 = vld [vmem:[%s4828_s1 + $0x270] ss:$8 sps:$4 sm:$0xff]   ;;  %v3210_v9 = vld [vmem:[%s4828_s1 + $0x264] ss:$8 sps:$4 sm:$0xff]  }
  0x2c   : > { %2122 = vmatprep.subr.bf16.mxu1 %v3141_v25  ;;  %v3205_v10 = vld [vmem:[%s4828_s1 + $0x370] ss:$8 sps:$4 sm:$0xff]   ;;  %v3213_v11 = vld [vmem:[%s4828_s1 + $0x364] ss:$8 sps:$4 sm:$0xff]   ;;  %v3208_v12 = vld [vmem:[%s4828_s1 + $0x260] ss:$8 sps:$4 sm:$0xff]  }
  0x2d   : > { %v3216_v13 = vld [vmem:[%s4828_s1 + $0x254] ss:$8 sps:$4 sm:$0xff]   ;;  %v3211_v14 = vld [vmem:[%s4828_s1 + $0x360] ss:$8 sps:$4 sm:$0xff]   ;;  %v3214_v16 = vld [vmem:[%s4828_s1 + $0x250] ss:$8 sps:$4 sm:$0xff]  }
  0x2e   : > { %2082 = vmatpush1.bf16.msra.mxu0 %v3140_v26  ;;  %v3219_v15 = vld [vmem:[%s4828_s1 + $0x354] ss:$8 sps:$4 sm:$0xff]   ;;  %v3222_v17 = vld [vmem:[%s4828_s1 + $0x244] ss:$8 sps:$4 sm:$0xff]   ;;  %v3217_v18 = vld [vmem:[%s4828_s1 + $0x350] ss:$8 sps:$4 sm:$0xff]  }
  0x2f   : > { %2083 = vmatprep.subr.bf16.mxu0 %v3144_v27  ;;  %2123 = vmatpush1.bf16.msra.mxu1 %v3143_v28  ;;  %v3225_v19 = vld [vmem:[%s4828_s1 + $0x344] ss:$8 sps:$4 sm:$0xff]   ;;  %v3220_v20 = vld [vmem:[%s4828_s1 + $0x240] ss:$8 sps:$4 sm:$0xff]   ;;  %v3228_v21 = vld [vmem:[%s4828_s1 + $0x234] ss:$8 sps:$4 sm:$0xff]  }
  0x30   : > { %2124 = vmatprep.subr.bf16.mxu1 %v3147_v29  ;;  %v3223_v22 = vld [vmem:[%s4828_s1 + $0x340] ss:$8 sps:$4 sm:$0xff]   ;;  %v3231_v23 = vld [vmem:[%s4828_s1 + $0x334] ss:$8 sps:$4 sm:$0xff]   ;;  %v3226_v24 = vld [vmem:[%s4828_s1 + $0x230] ss:$8 sps:$4 sm:$0xff]  }
  0x31   : > { %v3234_v25 = vld [vmem:[%s4828_s1 + $0x224] ss:$8 sps:$4 sm:$0xff]   ;;  %v3229_v26 = vld [vmem:[%s4828_s1 + $0x330] ss:$8 sps:$4 sm:$0xff]   ;;  %v3232_v28 = vld [vmem:[%s4828_s1 + $0x220] ss:$8 sps:$4 sm:$0xff]  }
  0x32   : > { %2084 = vmatpush1.bf16.msra.mxu0 %v3146_v30  ;;  %v3237_v27 = vld [vmem:[%s4828_s1 + $0x324] ss:$8 sps:$4 sm:$0xff]   ;;  %v3240_v29 = vld [vmem:[%s4828_s1 + $0x214] ss:$8 sps:$4 sm:$0xff]   ;;  %v3235_v30 = vld [vmem:[%s4828_s1 + $0x320] ss:$8 sps:$4 sm:$0xff]  }
  0x33   : > { %2085 = vmatprep.subr.bf16.mxu0 %v3150_v31  ;;  %2125 = vmatpush1.bf16.msra.mxu1 %v3149_v32  ;;  %v3243_v31 = vld [vmem:[%s4828_s1 + $0x314] ss:$8 sps:$4 sm:$0xff]   ;;  %v3253_v46 = vld [vmem:[%s4828_s1 + $0x3f0] ss:$8 sps:$4 sm:$0xff]   ;;  %v3256_v48 = vld [vmem:[%s4828_s1 + $0x2e0] ss:$8 sps:$4 sm:$0xff]  }
  0x34   : > { %2126 = vmatprep.subr.bf16.mxu1 %v3153_v33  ;;  %v4002_v32 = vld [vmem:[%s3856_s7 + $0x10] sm:$0xff]  ;;  %v3259_v50 = vld [vmem:[%s4828_s1 + $0x3e0] ss:$8 sps:$4 sm:$0xff]   ;;  %s3556_s27 = scalar_lea.vmem %s2623_s11, 16 }
  0x35   : > { %v3238_v33 = vld [vmem:[%s4828_s1 + $0x210] ss:$8 sps:$4 sm:$0xff]   ;;  %p3557_p12 = scmp.ne.s32.totalorder %s2623_s11, %s3556_s27 }
  0x36   : > { %2086 = vmatpush2.bf16.msra.mxu0 %v3152_v34  ;;  %v2705_v34 = vcombine.high %v4002_v32, %v4002_v32  ;;  %v3262_v52 = vld [vmem:[%s4828_s1 + $0x2d0] ss:$8 sps:$4 sm:$0xff]  }
  0x37   : > { %2087 = vmatprep.subr.bf16.mxu0 %v3156_v35  ;;  %2127 = vmatpush2.bf16.msra.mxu1 %v3155_v36  ;;  %v4010_v35 = vld [vmem:[%s3856_s7 + $0x18] sm:$0xff]  ;;  %v3246_v36 = vld [vmem:[%s4828_s1 + $0x204] ss:$8 sps:$4 sm:$0xff]   ;;  %p3558_p13 = pnand %p3557_p12, %p3707_p4 }
  0x38   : > { %2128 = vmatprep.subr.bf16.mxu1 %v3159_v37  ;;  %v2707_v37 = vcombine.high %v4010_v35, %v4010_v35 }
  0x39   : > { %p3559_p0 = pneg %p3558_p13 }
  0x3a   : > { %2088 = vmatpush2.bf16.msra.mxu0 %v3158_v38  ;;  %v3241_v38 = vld [vmem:[%s4828_s1 + $0x310] ss:$8 sps:$4 sm:$0xff]  }
  0x3b   : > { %2089 = vmatprep.subr.bf16.mxu0 %v3162_v39  ;;  %2129 = vmatpush2.bf16.msra.mxu1 %v3161_v40  ;;  %v3249_v39 = vld [vmem:[%s4828_s1 + $0x304] ss:$8 sps:$4 sm:$0xff]   ;;  %v3244_v40 = vld [vmem:[%s4828_s1 + $0x200] ss:$8 sps:$4 sm:$0xff]  }
  0x3c   : > { %2130 = vmatprep.subr.bf16.mxu1 %v3165_v41  ;;  %v3252_v41 = vld [vmem:[%s4828_s1 + $0x2f4] ss:$8 sps:$4 sm:$0xff]  }
  0x3e   : > { %2090 = vmatpush2.bf16.msra.mxu0 %v3164_v42  ;;  %v3247_v42 = vld [vmem:[%s4828_s1 + $0x300] ss:$8 sps:$4 sm:$0xff]  }
  0x3f   : > { %2091 = vmatprep.subr.bf16.mxu0 %v3168_v43  ;;  %2131 = vmatpush2.bf16.msra.mxu1 %v3167_v44  ;;  %v3255_v43 = vld [vmem:[%s4828_s1 + $0x3f4] ss:$8 sps:$4 sm:$0xff]   ;;  %v3250_v44 = vld [vmem:[%s4828_s1 + $0x2f0] ss:$8 sps:$4 sm:$0xff]  }
  0x40   : > { %2132 = vmatprep.subr.bf16.mxu1 %v3171_v45  ;;  %v3258_v45 = vld [vmem:[%s4828_s1 + $0x2e4] ss:$8 sps:$4 sm:$0xff]  }
  0x42   : > { %2092 = vmatpush2.bf16.msra.mxu0 %v3170_v47  ;;  %v3261_v47 = vld [vmem:[%s4828_s1 + $0x3e4] ss:$8 sps:$4 sm:$0xff]  }
  0x43   : > { %2093 = vmatprep.subr.bf16.mxu0 %v3174_v49  ;;  %2133 = vmatpush2.bf16.msra.mxu1 %v3173_v51  ;;  %v3264_v49 = vld [vmem:[%s4828_s1 + $0x2d4] ss:$8 sps:$4 sm:$0xff]  }
  0x44   : > { %2134 = vmatprep.subr.bf16.mxu1 %v3177_v53  ;;  %v3267_v51 = vld [vmem:[%s4828_s1 + $0x3d4] ss:$8 sps:$4 sm:$0xff]   ;;  %v3270_v53 = vld [vmem:[%s4828_s1 + $0x2c4] ss:$8 sps:$4 sm:$0xff]  }
  0x46   : > { %2094 = vmatpush2.bf16.msra.mxu0 %v3176_v54  ;;  %v3265_v54 = vld [vmem:[%s4828_s1 + $0x3d0] ss:$8 sps:$4 sm:$0xff]  }
  0x47   : > { %2095 = vmatprep.subr.bf16.mxu0 %v3180_v55  ;;  %2135 = vmatpush2.bf16.msra.mxu1 %v3179_v56  ;;  %v3273_v55 = vld [vmem:[%s4828_s1 + $0x3c4] ss:$8 sps:$4 sm:$0xff]   ;;  %v3268_v56 = vld [vmem:[%s4828_s1 + $0x2c0] ss:$8 sps:$4 sm:$0xff]  }
  0x48   : > { %2136 = vmatprep.subr.bf16.mxu1 %v3183_v57  ;;  %v3276_v57 = vld [vmem:[%s4828_s1 + $0x2b4] ss:$8 sps:$4 sm:$0xff]  }
  0x4a   : > { %2096 = vmatpush2.bf16.msra.mxu0 %v3182_v58  ;;  %v3271_v58 = vld [vmem:[%s4828_s1 + $0x3c0] ss:$8 sps:$4 sm:$0xff]  }
  0x4b   : > { %2097 = vmatprep.subr.bf16.mxu0 %v3186_v59  ;;  %2137 = vmatpush2.bf16.msra.mxu1 %v3185_v60  ;;  %v3279_v59 = vld [vmem:[%s4828_s1 + $0x3b4] ss:$8 sps:$4 sm:$0xff]   ;;  %v3274_v60 = vld [vmem:[%s4828_s1 + $0x2b0] ss:$8 sps:$4 sm:$0xff]  }
  0x4c   : > { %2138 = vmatprep.subr.bf16.mxu1 %v3189_v61  ;;  %v3282_v61 = vld [vmem:[%s4828_s1 + $0x2a4] ss:$8 sps:$4 sm:$0xff]  }
  0x4e   : > { %2098 = vmatpush2.bf16.msra.mxu0 %v3188_v62  ;;  %v3277_v62 = vld [vmem:[%s4828_s1 + $0x3b0] ss:$8 sps:$4 sm:$0xff]  }
  0x4f   : > { %2099 = vmatprep.subr.bf16.mxu0 %v3192_v63  ;;  %2139 = vmatpush2.bf16.msra.mxu1 %v3191_v0  ;;  %v3285_v63 = vld [vmem:[%s4828_s1 + $0x3a4] ss:$8 sps:$4 sm:$0xff]   ;;  %v3280_v0 = vld [vmem:[%s4828_s1 + $0x2a0] ss:$8 sps:$4 sm:$0xff]  }
  0x50   : > { %2140 = vmatprep.subr.bf16.mxu1 %v3195_v1  ;;  %v3288_v1 = vld [vmem:[%s4828_s1 + $0x294] ss:$8 sps:$4 sm:$0xff]  }
  0x52   : > { %2100 = vmatpush2.bf16.msra.mxu0 %v3194_v2  ;;  %v3283_v2 = vld [vmem:[%s4828_s1 + $0x3a0] ss:$8 sps:$4 sm:$0xff]  }
  0x53   : > { %2151 = vmatprep.subr.bf16.mxu0 %v3202_v3  ;;  %2141 = vmatpush2.bf16.msra.mxu1 %v3199_v4  ;;  %v3291_v3 = vld [vmem:[%s4828_s1 + $0x394] ss:$8 sps:$4 sm:$0xff]   ;;  %v3286_v4 = vld [vmem:[%s4828_s1 + $0x290] ss:$8 sps:$4 sm:$0xff]  }
  0x54   : > { %2192 = vmatprep.subr.bf16.mxu1 %v3207_v6  ;;  %v3289_v6 = vld [vmem:[%s4828_s1 + $0x390] ss:$8 sps:$4 sm:$0xff]  }
  0x55   : > { %2102 = vmatmul.mubr.bf16.vlgmr.msra.gmra.mxu0 %v2700_v5  ;;  %v3294_v5 = vld [vmem:[%s4828_s1 + $0x284] ss:$8 sps:$4 sm:$0xff]  }
  0x56   : > { %2152 = vmatpush1.bf16.msra.mxu0 %v3200_v7  ;;  %2143 = vmatmul.mubr.bf16.vlgmr.msra.gmra.mxu1 %v2702_v8  ;;  %v3297_v7 = vld [vmem:[%s4828_s1 + $0x384] ss:$8 sps:$4 sm:$0xff]   ;;  %v3292_v8 = vld [vmem:[%s4828_s1 + $0x280] ss:$8 sps:$4 sm:$0xff]  }
  0x57   : > { %2153 = vmatprep.subr.bf16.mxu0 %v3210_v9  ;;  %2193 = vmatpush1.bf16.msra.mxu1 %v3205_v10  ;;  %v3302_v9 = vld [vmem:[%s4828_s1 + $0x474] ss:$8 sps:$4 sm:$0xff]   ;;  %v3295_v10 = vld [vmem:[%s4828_s1 + $0x380] ss:$8 sps:$4 sm:$0xff]  }
  0x58   : > { %2194 = vmatprep.subr.bf16.mxu1 %v3213_v11  ;;  %2183 = vmatprep.mubr.bf16.mxu0 %v2705_v34  ;;  %v2704_v11 = vcombine.low %v4002_v32, %v4002_v32  ;;  %v3325_v32 = vld [vmem:[%s4828_s1 + $0x544] ss:$8 sps:$4 sm:$0xff]   ;;  %v3328_v34 = vld [vmem:[%s4828_s1 + $0x434] ss:$8 sps:$4 sm:$0xff]  }
  0x59   : > { %2224 = vmatprep.mubr.bf16.mxu1 %v2707_v37  ;;  %v3326_v37 = vld [vmem:[%s4828_s1 + $0x430] ss:$8 sps:$4 sm:$0xff]  }
  0x5a   : > { %2154 = vmatpush1.bf16.msra.mxu0 %v3208_v12  ;;  %v3307_v12 = vld [vmem:[%s4828_s1 + $0x574] ss:$8 sps:$4 sm:$0xff]  }
  0x5b   : > { %2155 = vmatprep.subr.bf16.mxu0 %v3216_v13  ;;  %2195 = vmatpush1.bf16.msra.mxu1 %v3211_v14  ;;  %v3300_v13 = vld [vmem:[%s4828_s1 + $0x470] ss:$8 sps:$4 sm:$0xff]   ;;  %v252_v14 = vlaneseq }
  0x5c   : > { %2196 = vmatprep.subr.bf16.mxu1 %v3219_v15  ;;  %v2706_v15 = vcombine.low %v4010_v35, %v4010_v35  ;;  %v3323_v35 = vld [vmem:[%s4828_s1 + $0x540] ss:$8 sps:$4 sm:$0xff]  }
  0x5d   : > { %vm4148_vm0 = vcmp.lt.s32.totalorder %v252_v14, 256 }
  0x5e   : > { %2156 = vmatpush1.bf16.msra.mxu0 %v3214_v16  ;;  %v3310_v16 = vld [vmem:[%s4828_s1 + $0x464] ss:$8 sps:$4 sm:$0xff]  }
  0x5f   : > { %2157 = vmatprep.subr.bf16.mxu0 %v3222_v17  ;;  %2197 = vmatpush1.bf16.msra.mxu1 %v3217_v18  ;;  %v3305_v17 = vld [vmem:[%s4828_s1 + $0x570] ss:$8 sps:$4 sm:$0xff]   ;;  %v4145_v18 = vld [vmem:[%s3856_s7 + $0x20] sm:$0xff] }
  0x60   : > { %2198 = vmatprep.subr.bf16.mxu1 %v3225_v19  ;;  %v2525_v19 = vld [vmem:[%s4831_s4] sm:$0x1] }
  0x62   : > { %2158 = vmatpush1.bf16.msra.mxu0 %v3220_v20  ;;  %v3308_v20 = vld [vmem:[%s4828_s1 + $0x460] ss:$8 sps:$4 sm:$0xff]  }
  0x63   : > { %2159 = vmatprep.subr.bf16.mxu0 %v3228_v21  ;;  %2199 = vmatpush1.bf16.msra.mxu1 %v3223_v22  ;;  %v3313_v21 = vld [vmem:[%s4828_s1 + $0x564] ss:$8 sps:$4 sm:$0xff]   ;;  %v2709_v22 = vcombine.high %v4145_v18, %v4145_v18 }
  0x64   : > { %2200 = vmatprep.subr.bf16.mxu1 %v3231_v23  ;;  %v3634_v23 = vmov 0.0  }
  0x65   : > { %256 = vst.msk [vmem:[#allocation2] sm:$0x3] %vm4148_vm0, %v3634_v23  ;;  %v3395_v23 = vld [vmem:[%s4828_s1 + $0x580] ss:$8 sps:$4 sm:$0xff]  }
  0x66   : > { %2160 = vmatpush1.bf16.msra.mxu0 %v3226_v24  ;;  %v4163_v24 = vld [vmem:[%s3856_s7 + $0x28] sm:$0xff] }
  0x67   : > { %2161 = vmatprep.subr.bf16.mxu0 %v3234_v25  ;;  %2201 = vmatpush1.bf16.msra.mxu1 %v3229_v26  ;;  %v3316_v25 = vld [vmem:[%s4828_s1 + $0x454] ss:$8 sps:$4 sm:$0xff]   ;;  %v2711_v26 = vcombine.high %v4163_v24, %v4163_v24 }
  0x68   : > { %2202 = vmatprep.subr.bf16.mxu1 %v3237_v27  ;;  %v3311_v27 = vld [vmem:[%s4828_s1 + $0x560] ss:$8 sps:$4 sm:$0xff]  }
  0x6a   : > { %2162 = vmatpush1.bf16.msra.mxu0 %v3232_v28  ;;  %v3319_v28 = vld [vmem:[%s4828_s1 + $0x554] ss:$8 sps:$4 sm:$0xff]  }
  0x6b   : > { %2163 = vmatprep.subr.bf16.mxu0 %v3240_v29  ;;  %2203 = vmatpush1.bf16.msra.mxu1 %v3235_v30  ;;  %v3314_v29 = vld [vmem:[%s4828_s1 + $0x450] ss:$8 sps:$4 sm:$0xff]   ;;  %v3322_v30 = vld [vmem:[%s4828_s1 + $0x444] ss:$8 sps:$4 sm:$0xff]  }
  0x6c   : > { %2204 = vmatprep.subr.bf16.mxu1 %v3243_v31  ;;  %v3317_v31 = vld [vmem:[%s4828_s1 + $0x550] ss:$8 sps:$4 sm:$0xff]  }
  0x6e   : > { %2164 = vmatpush1.bf16.msra.mxu0 %v3238_v33  ;;  %v3320_v33 = vld [vmem:[%s4828_s1 + $0x440] ss:$8 sps:$4 sm:$0xff]  }
  0x6f   : > { %2165 = vmatprep.subr.bf16.mxu0 %v3246_v36  ;;  %2205 = vmatpush1.bf16.msra.mxu1 %v3241_v38  ;;  %v3331_v36 = vld [vmem:[%s4828_s1 + $0x534] ss:$8 sps:$4 sm:$0xff]   ;;  %v3334_v38 = vld [vmem:[%s4828_s1 + $0x424] ss:$8 sps:$4 sm:$0xff]  }
  0x70   : > { %2206 = vmatprep.subr.bf16.mxu1 %v3249_v39  ;;  %v3329_v39 = vld [vmem:[%s4828_s1 + $0x530] ss:$8 sps:$4 sm:$0xff]  }
  0x72   : > { %2166 = vmatpush1.bf16.msra.mxu0 %v3244_v40  ;;  %v3337_v40 = vld [vmem:[%s4828_s1 + $0x524] ss:$8 sps:$4 sm:$0xff]  }
  0x73   : > { %2167 = vmatprep.subr.bf16.mxu0 %v3252_v41  ;;  %2207 = vmatpush1.bf16.msra.mxu1 %v3247_v42  ;;  %v3332_v41 = vld [vmem:[%s4828_s1 + $0x420] ss:$8 sps:$4 sm:$0xff]   ;;  %v3340_v42 = vld [vmem:[%s4828_s1 + $0x414] ss:$8 sps:$4 sm:$0xff]  }
  0x74   : > { %2208 = vmatprep.subr.bf16.mxu1 %v3255_v43  ;;  %v3335_v43 = vld [vmem:[%s4828_s1 + $0x520] ss:$8 sps:$4 sm:$0xff]  }
  0x76   : > { %2168 = vmatpush2.bf16.msra.mxu0 %v3250_v44  ;;  %v3343_v44 = vld [vmem:[%s4828_s1 + $0x514] ss:$8 sps:$4 sm:$0xff]  }
  0x77   : > { %2169 = vmatprep.subr.bf16.mxu0 %v3258_v45  ;;  %2209 = vmatpush2.bf16.msra.mxu1 %v3253_v46  ;;  %v3338_v45 = vld [vmem:[%s4828_s1 + $0x410] ss:$8 sps:$4 sm:$0xff]   ;;  %v3346_v46 = vld [vmem:[%s4828_s1 + $0x404] ss:$8 sps:$4 sm:$0xff]  }
  0x78   : > { %2210 = vmatprep.subr.bf16.mxu1 %v3261_v47  ;;  %v3341_v47 = vld [vmem:[%s4828_s1 + $0x510] ss:$8 sps:$4 sm:$0xff]  }
  0x7a   : > { %2170 = vmatpush2.bf16.msra.mxu0 %v3256_v48  ;;  %v3349_v48 = vld [vmem:[%s4828_s1 + $0x504] ss:$8 sps:$4 sm:$0xff]  }
  0x7b   : > { %2171 = vmatprep.subr.bf16.mxu0 %v3264_v49  ;;  %2211 = vmatpush2.bf16.msra.mxu1 %v3259_v50  ;;  %v3344_v49 = vld [vmem:[%s4828_s1 + $0x400] ss:$8 sps:$4 sm:$0xff]   ;;  %v3352_v50 = vld [vmem:[%s4828_s1 + $0x4f4] ss:$8 sps:$4 sm:$0xff]  }
  0x7c   : > { %2212 = vmatprep.subr.bf16.mxu1 %v3267_v51  ;;  %v3347_v51 = vld [vmem:[%s4828_s1 + $0x500] ss:$8 sps:$4 sm:$0xff]  }
  0x7e   : > { %2172 = vmatpush2.bf16.msra.mxu0 %v3262_v52  ;;  %v3355_v52 = vld [vmem:[%s4828_s1 + $0x5f4] ss:$8 sps:$4 sm:$0xff]  }
  0x7f   : > { %2173 = vmatprep.subr.bf16.mxu0 %v3270_v53  ;;  %2213 = vmatpush2.bf16.msra.mxu1 %v3265_v54  ;;  %v3350_v53 = vld [vmem:[%s4828_s1 + $0x4f0] ss:$8 sps:$4 sm:$0xff]   ;;  %v3358_v54 = vld [vmem:[%s4828_s1 + $0x4e4] ss:$8 sps:$4 sm:$0xff]  }
  0x80   : > { %2214 = vmatprep.subr.bf16.mxu1 %v3273_v55  ;;  %v3353_v55 = vld [vmem:[%s4828_s1 + $0x5f0] ss:$8 sps:$4 sm:$0xff]  }
  0x82   : > { %2174 = vmatpush2.bf16.msra.mxu0 %v3268_v56  ;;  %v3361_v56 = vld [vmem:[%s4828_s1 + $0x5e4] ss:$8 sps:$4 sm:$0xff]  }
  0x83   : > { %2175 = vmatprep.subr.bf16.mxu0 %v3276_v57  ;;  %2215 = vmatpush2.bf16.msra.mxu1 %v3271_v58  ;;  %v3356_v57 = vld [vmem:[%s4828_s1 + $0x4e0] ss:$8 sps:$4 sm:$0xff]   ;;  %v3364_v58 = vld [vmem:[%s4828_s1 + $0x4d4] ss:$8 sps:$4 sm:$0xff]  }
  0x84   : > { %2216 = vmatprep.subr.bf16.mxu1 %v3279_v59  ;;  %v3359_v59 = vld [vmem:[%s4828_s1 + $0x5e0] ss:$8 sps:$4 sm:$0xff]  }
  0x86   : > { %2176 = vmatpush2.bf16.msra.mxu0 %v3274_v60  ;;  %v3367_v60 = vld [vmem:[%s4828_s1 + $0x5d4] ss:$8 sps:$4 sm:$0xff]  }
  0x87   : > { %2177 = vmatprep.subr.bf16.mxu0 %v3282_v61  ;;  %2217 = vmatpush2.bf16.msra.mxu1 %v3277_v62  ;;  %v3362_v61 = vld [vmem:[%s4828_s1 + $0x4d0] ss:$8 sps:$4 sm:$0xff]   ;;  %v3370_v62 = vld [vmem:[%s4828_s1 + $0x4c4] ss:$8 sps:$4 sm:$0xff]  }
  0x88   : > { %2218 = vmatprep.subr.bf16.mxu1 %v3285_v63  ;;  %v3365_v63 = vld [vmem:[%s4828_s1 + $0x5d0] ss:$8 sps:$4 sm:$0xff]  }
  0x8a   : > { %2178 = vmatpush2.bf16.msra.mxu0 %v3280_v0  ;;  %v3373_v0 = vld [vmem:[%s4828_s1 + $0x5c4] ss:$8 sps:$4 sm:$0xff]  }
  0x8b   : > { %2179 = vmatprep.subr.bf16.mxu0 %v3288_v1  ;;  %2219 = vmatpush2.bf16.msra.mxu1 %v3283_v2  ;;  %v3368_v1 = vld [vmem:[%s4828_s1 + $0x4c0] ss:$8 sps:$4 sm:$0xff]   ;;  %v3376_v2 = vld [vmem:[%s4828_s1 + $0x4b4] ss:$8 sps:$4 sm:$0xff]  }
  0x8c   : > { %2220 = vmatprep.subr.bf16.mxu1 %v3291_v3  ;;  %v3371_v3 = vld [vmem:[%s4828_s1 + $0x5c0] ss:$8 sps:$4 sm:$0xff]  }
  0x8e   : > { %2180 = vmatpush2.bf16.msra.mxu0 %v3286_v4  ;;  %v3379_v4 = vld [vmem:[%s4828_s1 + $0x5b4] ss:$8 sps:$4 sm:$0xff]  }
  0x8f   : > { %2181 = vmatprep.subr.bf16.mxu0 %v3294_v5  ;;  %2221 = vmatpush2.bf16.msra.mxu1 %v3289_v6  ;;  %v3374_v5 = vld [vmem:[%s4828_s1 + $0x4b0] ss:$8 sps:$4 sm:$0xff]   ;;  %v3382_v6 = vld [vmem:[%s4828_s1 + $0x4a4] ss:$8 sps:$4 sm:$0xff]  }
  0x90   : > { %2222 = vmatprep.subr.bf16.mxu1 %v3297_v7  ;;  %v3377_v7 = vld [vmem:[%s4828_s1 + $0x5b0] ss:$8 sps:$4 sm:$0xff]  }
  0x92   : > { %2182 = vmatpush2.bf16.msra.mxu0 %v3292_v8  ;;  %v3385_v8 = vld [vmem:[%s4828_s1 + $0x5a4] ss:$8 sps:$4 sm:$0xff]  }
  0x93   : > { %2233 = vmatprep.subr.bf16.mxu0 %v3302_v9  ;;  %2223 = vmatpush2.bf16.msra.mxu1 %v3295_v10  ;;  %v3380_v9 = vld [vmem:[%s4828_s1 + $0x4a0] ss:$8 sps:$4 sm:$0xff]   ;;  %v3388_v10 = vld [vmem:[%s4828_s1 + $0x494] ss:$8 sps:$4 sm:$0xff]  }
  0x94   : > { %2274 = vmatprep.subr.bf16.mxu1 %v3307_v12  ;;  %v3391_v12 = vld [vmem:[%s4828_s1 + $0x594] ss:$8 sps:$4 sm:$0xff]  }
  0x95   : > { %2184 = vmatmul.mubr.bf16.vlgmr.msra.gmra.mxu0 %v2704_v11  ;;  %v3383_v11 = vld [vmem:[%s4828_s1 + $0x5a0] ss:$8 sps:$4 sm:$0xff]  }
  0x96   : > { %2234 = vmatpush1.bf16.msra.mxu0 %v3300_v13  ;;  %2225 = vmatmul.mubr.bf16.vlgmr.msra.gmra.mxu1 %v2706_v15  ;;  %v3386_v13 = vld [vmem:[%s4828_s1 + $0x490] ss:$8 sps:$4 sm:$0xff]   ;;  %v3394_v15 = vld [vmem:[%s4828_s1 + $0x484] ss:$8 sps:$4 sm:$0xff]  }
  0x97   : > { %2235 = vmatprep.subr.bf16.mxu0 %v3310_v16  ;;  %2275 = vmatpush1.bf16.msra.mxu1 %v3305_v17  ;;  %v3389_v16 = vld [vmem:[%s4828_s1 + $0x590] ss:$8 sps:$4 sm:$0xff]   ;;  %v3392_v17 = vld [vmem:[%s4828_s1 + $0x480] ss:$8 sps:$4 sm:$0xff]  }
  0x98   : > { %2265 = vmatprep.mubr.bf16.mxu0 %v2709_v22  ;;  %2276 = vmatprep.subr.bf16.mxu1 %v3313_v21  ;;  %v3402_v21 = vld [vmem:[%s4828_s1 + $0x674] ss:$8 sps:$4 sm:$0xff]  }
  0x99   : > { %2306 = vmatprep.mubr.bf16.mxu1 %v2711_v26  ;;  %v4339_v22 = vld [vmem:[%s3856_s7 + $0x30] sm:$0xff] }
  0x9a   : > { %2236 = vmatpush1.bf16.msra.mxu0 %v3308_v20  ;;  %v3397_v20 = vld [vmem:[%s4828_s1 + $0x584] ss:$8 sps:$4 sm:$0xff]   ;;  %v3407_v26 = vld [vmem:[%s4828_s1 + $0x774] ss:$8 sps:$4 sm:$0xff]  }
  0x9b   : > { %2237 = vmatprep.subr.bf16.mxu0 %v3316_v25  ;;  %2277 = vmatpush1.bf16.msra.mxu1 %v3311_v27  ;;  %v2708_v25 = vcombine.low %v4145_v18, %v4145_v18  ;;  %v4350_v27 = vld [vmem:[%s3856_s7 + $0x38] sm:$0xff]  ;;  %v3410_v18 = vld [vmem:[%s4828_s1 + $0x664] ss:$8 sps:$4 sm:$0xff]  }
  0x9c   : > { %2278 = vmatprep.subr.bf16.mxu1 %v3319_v28  ;;  %v3400_v28 = vld [vmem:[%s4828_s1 + $0x670] ss:$8 sps:$4 sm:$0xff]  }
  0x9e   : > { %2238 = vmatpush1.bf16.msra.mxu0 %v3314_v29  ;;  %v2713_v29 = vcombine.high %v4339_v22, %v4339_v22 }
  0x9f   : > { %2239 = vmatprep.subr.bf16.mxu0 %v3322_v30  ;;  %2279 = vmatpush1.bf16.msra.mxu1 %v3317_v31  ;;  %v2710_v30 = vcombine.low %v4163_v24, %v4163_v24  ;;  %v3405_v31 = vld [vmem:[%s4828_s1 + $0x770] ss:$8 sps:$4 sm:$0xff]   ;;  %v3408_v24 = vld [vmem:[%s4828_s1 + $0x660] ss:$8 sps:$4 sm:$0xff]  }
  0xa0   : > { %2280 = vmatprep.subr.bf16.mxu1 %v3325_v32  ;;  %v2715_v32 = vcombine.high %v4350_v27, %v4350_v27 }
  0xa2   : > { %2240 = vmatpush1.bf16.msra.mxu0 %v3320_v33  ;;  %v3413_v33 = vld [vmem:[%s4828_s1 + $0x764] ss:$8 sps:$4 sm:$0xff]  }
  0xa3   : > { %2241 = vmatprep.subr.bf16.mxu0 %v3328_v34  ;;  %2281 = vmatpush1.bf16.msra.mxu1 %v3323_v35  ;;  %v3416_v34 = vld [vmem:[%s4828_s1 + $0x654] ss:$8 sps:$4 sm:$0xff]   ;;  %v3411_v35 = vld [vmem:[%s4828_s1 + $0x760] ss:$8 sps:$4 sm:$0xff]  }
  0xa4   : > { %2282 = vmatprep.subr.bf16.mxu1 %v3331_v36  ;;  %v3419_v36 = vld [vmem:[%s4828_s1 + $0x754] ss:$8 sps:$4 sm:$0xff]  }
  0xa6   : > { %2242 = vmatpush1.bf16.msra.mxu0 %v3326_v37  ;;  %v3414_v37 = vld [vmem:[%s4828_s1 + $0x650] ss:$8 sps:$4 sm:$0xff]  }
  0xa7   : > { %2243 = vmatprep.subr.bf16.mxu0 %v3334_v38  ;;  %2283 = vmatpush1.bf16.msra.mxu1 %v3329_v39  ;;  %v3422_v38 = vld [vmem:[%s4828_s1 + $0x644] ss:$8 sps:$4 sm:$0xff]   ;;  %v3417_v39 = vld [vmem:[%s4828_s1 + $0x750] ss:$8 sps:$4 sm:$0xff]  }
  0xa8   : > { %2284 = vmatprep.subr.bf16.mxu1 %v3337_v40  ;;  %v3425_v40 = vld [vmem:[%s4828_s1 + $0x744] ss:$8 sps:$4 sm:$0xff]  }
  0xaa   : > { %2244 = vmatpush1.bf16.msra.mxu0 %v3332_v41  ;;  %v3420_v41 = vld [vmem:[%s4828_s1 + $0x640] ss:$8 sps:$4 sm:$0xff]  }
  0xab   : > { %2245 = vmatprep.subr.bf16.mxu0 %v3340_v42  ;;  %2285 = vmatpush1.bf16.msra.mxu1 %v3335_v43  ;;  %v3428_v42 = vld [vmem:[%s4828_s1 + $0x634] ss:$8 sps:$4 sm:$0xff]   ;;  %v3423_v43 = vld [vmem:[%s4828_s1 + $0x740] ss:$8 sps:$4 sm:$0xff]  }
  0xac   : > { %2286 = vmatprep.subr.bf16.mxu1 %v3343_v44  ;;  %v3431_v44 = vld [vmem:[%s4828_s1 + $0x734] ss:$8 sps:$4 sm:$0xff]  }
  0xae   : > { %2246 = vmatpush1.bf16.msra.mxu0 %v3338_v45  ;;  %v3426_v45 = vld [vmem:[%s4828_s1 + $0x630] ss:$8 sps:$4 sm:$0xff]  }
  0xaf   : > { %2247 = vmatprep.subr.bf16.mxu0 %v3346_v46  ;;  %2287 = vmatpush1.bf16.msra.mxu1 %v3341_v47  ;;  %v3434_v46 = vld [vmem:[%s4828_s1 + $0x624] ss:$8 sps:$4 sm:$0xff]   ;;  %v3429_v47 = vld [vmem:[%s4828_s1 + $0x730] ss:$8 sps:$4 sm:$0xff]  }
  0xb0   : > { %2288 = vmatprep.subr.bf16.mxu1 %v3349_v48  ;;  %v3437_v48 = vld [vmem:[%s4828_s1 + $0x724] ss:$8 sps:$4 sm:$0xff]  }
  0xb2   : > { %2248 = vmatpush1.bf16.msra.mxu0 %v3344_v49  ;;  %v3432_v49 = vld [vmem:[%s4828_s1 + $0x620] ss:$8 sps:$4 sm:$0xff]  }
  0xb3   : > { %2249 = vmatprep.subr.bf16.mxu0 %v3352_v50  ;;  %2289 = vmatpush1.bf16.msra.mxu1 %v3347_v51  ;;  %v3440_v50 = vld [vmem:[%s4828_s1 + $0x614] ss:$8 sps:$4 sm:$0xff]   ;;  %v3435_v51 = vld [vmem:[%s4828_s1 + $0x720] ss:$8 sps:$4 sm:$0xff]  }
  0xb4   : > { %2290 = vmatprep.subr.bf16.mxu1 %v3355_v52  ;;  %v3443_v52 = vld [vmem:[%s4828_s1 + $0x714] ss:$8 sps:$4 sm:$0xff]  }
  0xb6   : > { %2250 = vmatpush2.bf16.msra.mxu0 %v3350_v53  ;;  %v3438_v53 = vld [vmem:[%s4828_s1 + $0x610] ss:$8 sps:$4 sm:$0xff]  }
  0xb7   : > { %2251 = vmatprep.subr.bf16.mxu0 %v3358_v54  ;;  %2291 = vmatpush2.bf16.msra.mxu1 %v3353_v55  ;;  %v3446_v54 = vld [vmem:[%s4828_s1 + $0x604] ss:$8 sps:$4 sm:$0xff]   ;;  %v3441_v55 = vld [vmem:[%s4828_s1 + $0x710] ss:$8 sps:$4 sm:$0xff]  }
  0xb8   : > { %2292 = vmatprep.subr.bf16.mxu1 %v3361_v56  ;;  %v3449_v56 = vld [vmem:[%s4828_s1 + $0x704] ss:$8 sps:$4 sm:$0xff]  }
  0xba   : > { %2252 = vmatpush2.bf16.msra.mxu0 %v3356_v57  ;;  %v3444_v57 = vld [vmem:[%s4828_s1 + $0x600] ss:$8 sps:$4 sm:$0xff]  }
  0xbb   : > { %2253 = vmatprep.subr.bf16.mxu0 %v3364_v58  ;;  %2293 = vmatpush2.bf16.msra.mxu1 %v3359_v59  ;;  %v3452_v58 = vld [vmem:[%s4828_s1 + $0x6f4] ss:$8 sps:$4 sm:$0xff]   ;;  %v3447_v59 = vld [vmem:[%s4828_s1 + $0x700] ss:$8 sps:$4 sm:$0xff]  }
  0xbc   : > { %2294 = vmatprep.subr.bf16.mxu1 %v3367_v60  ;;  %v3455_v60 = vld [vmem:[%s4828_s1 + $0x7f4] ss:$8 sps:$4 sm:$0xff]  }
  0xbe   : > { %2254 = vmatpush2.bf16.msra.mxu0 %v3362_v61  ;;  %v3450_v61 = vld [vmem:[%s4828_s1 + $0x6f0] ss:$8 sps:$4 sm:$0xff]  }
  0xbf   : > { %2255 = vmatprep.subr.bf16.mxu0 %v3370_v62  ;;  %2295 = vmatpush2.bf16.msra.mxu1 %v3365_v63  ;;  %v3458_v62 = vld [vmem:[%s4828_s1 + $0x6e4] ss:$8 sps:$4 sm:$0xff]   ;;  %v3453_v63 = vld [vmem:[%s4828_s1 + $0x7f0] ss:$8 sps:$4 sm:$0xff]  }
  0xc0   : > { %2296 = vmatprep.subr.bf16.mxu1 %v3373_v0  ;;  %v3461_v0 = vld [vmem:[%s4828_s1 + $0x7e4] ss:$8 sps:$4 sm:$0xff]  }
  0xc2   : > { %2256 = vmatpush2.bf16.msra.mxu0 %v3368_v1  ;;  %v3456_v1 = vld [vmem:[%s4828_s1 + $0x6e0] ss:$8 sps:$4 sm:$0xff]  }
  0xc3   : > { %2257 = vmatprep.subr.bf16.mxu0 %v3376_v2  ;;  %2297 = vmatpush2.bf16.msra.mxu1 %v3371_v3  ;;  %v3464_v2 = vld [vmem:[%s4828_s1 + $0x6d4] ss:$8 sps:$4 sm:$0xff]   ;;  %v3459_v3 = vld [vmem:[%s4828_s1 + $0x7e0] ss:$8 sps:$4 sm:$0xff]  }
  0xc4   : > { %2298 = vmatprep.subr.bf16.mxu1 %v3379_v4  ;;  %v3467_v4 = vld [vmem:[%s4828_s1 + $0x7d4] ss:$8 sps:$4 sm:$0xff]  }
  0xc6   : > { %2258 = vmatpush2.bf16.msra.mxu0 %v3374_v5  ;;  %v3462_v5 = vld [vmem:[%s4828_s1 + $0x6d0] ss:$8 sps:$4 sm:$0xff]  }
  0xc7   : > { %2259 = vmatprep.subr.bf16.mxu0 %v3382_v6  ;;  %2299 = vmatpush2.bf16.msra.mxu1 %v3377_v7  ;;  %v3470_v6 = vld [vmem:[%s4828_s1 + $0x6c4] ss:$8 sps:$4 sm:$0xff]   ;;  %v3465_v7 = vld [vmem:[%s4828_s1 + $0x7d0] ss:$8 sps:$4 sm:$0xff]  }
  0xc8   : > { %2300 = vmatprep.subr.bf16.mxu1 %v3385_v8  ;;  %v3473_v8 = vld [vmem:[%s4828_s1 + $0x7c4] ss:$8 sps:$4 sm:$0xff]  }
  0xca   : > { %2260 = vmatpush2.bf16.msra.mxu0 %v3380_v9  ;;  %v3468_v9 = vld [vmem:[%s4828_s1 + $0x6c0] ss:$8 sps:$4 sm:$0xff]  }
  0xcb   : > { %2261 = vmatprep.subr.bf16.mxu0 %v3388_v10  ;;  %2301 = vmatpush2.bf16.msra.mxu1 %v3383_v11  ;;  %v3476_v10 = vld [vmem:[%s4828_s1 + $0x6b4] ss:$8 sps:$4 sm:$0xff]   ;;  %v3471_v11 = vld [vmem:[%s4828_s1 + $0x7c0] ss:$8 sps:$4 sm:$0xff]  }
  0xcc   : > { %2302 = vmatprep.subr.bf16.mxu1 %v3391_v12  ;;  %v3479_v12 = vld [vmem:[%s4828_s1 + $0x7b4] ss:$8 sps:$4 sm:$0xff]  }
  0xce   : > { %2262 = vmatpush2.bf16.msra.mxu0 %v3386_v13  ;;  %v3474_v13 = vld [vmem:[%s4828_s1 + $0x6b0] ss:$8 sps:$4 sm:$0xff]  }
  0xcf   : > { %2263 = vmatprep.subr.bf16.mxu0 %v3394_v15  ;;  %2303 = vmatpush2.bf16.msra.mxu1 %v3389_v16  ;;  %v3482_v15 = vld [vmem:[%s4828_s1 + $0x6a4] ss:$8 sps:$4 sm:$0xff]   ;;  %v3477_v16 = vld [vmem:[%s4828_s1 + $0x7b0] ss:$8 sps:$4 sm:$0xff]  }
  0xd0   : > { %2304 = vmatprep.subr.bf16.mxu1 %v3397_v20  ;;  %v3480_v20 = vld [vmem:[%s4828_s1 + $0x6a0] ss:$8 sps:$4 sm:$0xff]  }
  0xd2   : > { %2264 = vmatpush2.bf16.msra.mxu0 %v3392_v17  ;;  %v3485_v17 = vld [vmem:[%s4828_s1 + $0x7a4] ss:$8 sps:$4 sm:$0xff]  }
  0xd3   : > { %2315 = vmatprep.subr.bf16.mxu0 %v3402_v21  ;;  %2305 = vmatpush2.bf16.msra.mxu1 %v3395_v23  ;;  %v3488_v21 = vld [vmem:[%s4828_s1 + $0x694] ss:$8 sps:$4 sm:$0xff]   ;;  %v3483_v23 = vld [vmem:[%s4828_s1 + $0x7a0] ss:$8 sps:$4 sm:$0xff]  }
  0xd4   : > { %2356 = vmatprep.subr.bf16.mxu1 %v3407_v26  ;;  %v3486_v26 = vld [vmem:[%s4828_s1 + $0x690] ss:$8 sps:$4 sm:$0xff]  }
  0xd5   : > { %2266 = vmatmul.mubr.bf16.vlgmr.msra.gmra.mxu0 %v2708_v25  ;;  %v3491_v25 = vld [vmem:[%s4828_s1 + $0x794] ss:$8 sps:$4 sm:$0xff]  }
  0xd6   : > { %2316 = vmatpush1.bf16.msra.mxu0 %v3400_v28  ;;  %2347 = vmatprep.mubr.bf16.mxu0 %v2713_v29  ;;  %v4530_v28 = vshrl.u32 %v252_v14, 7  ;;  %v3494_v29 = vld [vmem:[%s4828_s1 + $0x684] ss:$8 sps:$4 sm:$0xff]   ;;  %v3492_v14 = vld [vmem:[%s4828_s1 + $0x680] ss:$8 sps:$4 sm:$0xff]  }
  0xd7   : > { %2307 = vmatmul.mubr.bf16.vlgmr.msra.gmra.mxu1 %v2710_v30  ;;  %2317 = vmatprep.subr.bf16.mxu0 %v3410_v18  ;;  %v3489_v30 = vld [vmem:[%s4828_s1 + $0x790] ss:$8 sps:$4 sm:$0xff]   ;;  %v3497_v18 = vld [vmem:[%s4828_s1 + $0x784] ss:$8 sps:$4 sm:$0xff]  }
  0xd8   : > { %2357 = vmatpush1.bf16.msra.mxu1 %v3405_v31  ;;  %2388 = vmatprep.mubr.bf16.mxu1 %v2715_v32  ;;  %v558_v31 = vsub.s32 0, %v4530_v28  ;;  %v554_v32 = vld [vmem:[%s4829_s2] sm:$0x3]  ;;  %vm2445_vm1 = vcmp.lt.s32.totalorder %v4530_v28, 4 }
  0xd9   : > { %2358 = vmatprep.subr.bf16.mxu1 %v3413_v33  ;;  %v3502_v33 = vld [vmem:[%s4828_s1 + $0x874] ss:$8 sps:$4 sm:$0xff]  }
  0xda   : > { %2318 = vmatpush1.bf16.msra.mxu0 %v3408_v24  ;;  %v4552_v24 = vld [vmem:[%s3856_s7 + $0x40] sm:$0xff]  ;;  %s3636_s7 = smov [#allocation3]  }
  0xdb   : > { %2319 = vmatprep.subr.bf16.mxu0 %v3416_v34  ;;  %v3495_v34 = vld [vmem:[%s4828_s1 + $0x780] ss:$8 sps:$4 sm:$0xff]   ;;  %s3560_s17 = sshll.u32 %s3636_s7, 4  ;;  %s3561_s17 = int_to_ptr.vmem [resolvable:$false] %s3560_s17 }
  0xdc   : > { %2359 = vmatpush1.bf16.msra.mxu1 %v3411_v35  ;;  %v562_v35 = vsub.s32 1, %v4530_v28  ;;  %s3562_s21 = scalar_lea.vmem %s3561_s17, 32  ;;  %p3563_p1 = scmp.lt.s32.totalorder %s2623_s11, %s3561_s17 }
  0xdd   : > { %2360 = vmatprep.subr.bf16.mxu1 %v3419_v36  ;;  %v2712_v36 = vcombine.low %v4339_v22, %v4339_v22  ;;  %p3564_p2 = scmp.lt.s32.totalorder %s3562_s21, %s3556_s27 }
  0xde   : > { %2320 = vmatpush1.bf16.msra.mxu0 %v3414_v37  ;;  %v559_v37 = vrot.slane %v554_v32, %v558_v31  ;;  %v563_v22 = vrot.slane %v554_v32, %v562_v35 }
  0xdf   : > { %2321 = vmatprep.subr.bf16.mxu0 %v3422_v38  ;;  %v3500_v38 = vld [vmem:[%s4828_s1 + $0x870] ss:$8 sps:$4 sm:$0xff]   ;;  %p3565_p3 = por %p3564_p2, %p3563_p1 }
  0xe0   : > { %2361 = vmatpush1.bf16.msra.mxu1 %v3417_v39  ;;  %v2717_v39 = vcombine.high %v4552_v24, %v4552_v24 }
  0xe1   : > { %2362 = vmatprep.subr.bf16.mxu1 %v3425_v40  ;;  %v2714_v40 = vcombine.low %v4350_v27, %v4350_v27  ;;  %v3510_v27 = vld [vmem:[%s4828_s1 + $0x854] ss:$8 sps:$4 sm:$0xff]   ;;  %p3566_p5 = pnand %p3565_p3, %p3559_p0 }
  0xe2   : > { %2322 = vmatpush1.bf16.msra.mxu0 %v3420_v41  ;;  %v3507_v41 = vld [vmem:[%s4828_s1 + $0x864] ss:$8 sps:$4 sm:$0xff]  }
  0xe3   : > { %2323 = vmatprep.subr.bf16.mxu0 %v3428_v42 }
  0xe4   : > { %2363 = vmatpush1.bf16.msra.mxu1 %v3423_v43 }
  0xe5   : > { %2364 = vmatprep.subr.bf16.mxu1 %v3431_v44  ;;  %v3505_v44 = vld [vmem:[%s4828_s1 + $0x860] ss:$8 sps:$4 sm:$0xff]  }
  0xe6   : > { %2324 = vmatpush1.bf16.msra.mxu0 %v3426_v45 }
  0xe7   : > { %2325 = vmatprep.subr.bf16.mxu0 %v3434_v46 }
  0xe8   : > { %2365 = vmatpush1.bf16.msra.mxu1 %v3429_v47 }
  0xe9   : > { %2366 = vmatprep.subr.bf16.mxu1 %v3437_v48 }
  0xea   : > { %2326 = vmatpush1.bf16.msra.mxu0 %v3432_v49 }
  0xeb   : > { %2327 = vmatprep.subr.bf16.mxu0 %v3440_v50 }
  0xec   : > { %2367 = vmatpush1.bf16.msra.mxu1 %v3435_v51 }
  0xed   : > { %2368 = vmatprep.subr.bf16.mxu1 %v3443_v52  ;;  %v3508_v52 = vld [vmem:[%s4828_s1 + $0x850] ss:$8 sps:$4 sm:$0xff]  }
  0xee   : > { %2328 = vmatpush1.bf16.msra.mxu0 %v3438_v53 }
  0xef   : > { %2329 = vmatprep.subr.bf16.mxu0 %v3446_v54  ;;  %v3513_v54 = vld [vmem:[%s4828_s1 + $0x844] ss:$8 sps:$4 sm:$0xff]  }
  0xf0   : > { %2369 = vmatpush1.bf16.msra.mxu1 %v3441_v55 }
  0xf1   : > { %2370 = vmatprep.subr.bf16.mxu1 %v3449_v56 }
  0xf2   : > { %2330 = vmatpush1.bf16.msra.mxu0 %v3444_v57  ;;  %v3511_v57 = vld [vmem:[%s4828_s1 + $0x840] ss:$8 sps:$4 sm:$0xff]  }
  0xf3   : > { %2331 = vmatprep.subr.bf16.mxu0 %v3452_v58  ;;  %v3516_v58 = vld [vmem:[%s4828_s1 + $0x834] ss:$8 sps:$4 sm:$0xff]  }
  0xf4   : > { %2371 = vmatpush1.bf16.msra.mxu1 %v3447_v59  ;;  %v3514_v59 = vld [vmem:[%s4828_s1 + $0x830] ss:$8 sps:$4 sm:$0xff]  }
  0xf5   : > { %2372 = vmatprep.subr.bf16.mxu1 %v3455_v60  ;;  %v3519_v60 = vld [vmem:[%s4828_s1 + $0x824] ss:$8 sps:$4 sm:$0xff]  }
  0xf6   : > { %2332 = vmatpush2.bf16.msra.mxu0 %v3450_v61  ;;  %v3517_v61 = vld [vmem:[%s4828_s1 + $0x820] ss:$8 sps:$4 sm:$0xff]  }
  0xf7   : > { %2333 = vmatprep.subr.bf16.mxu0 %v3458_v62  ;;  %v3522_v62 = vld [vmem:[%s4828_s1 + $0x814] ss:$8 sps:$4 sm:$0xff]  }
  0xf8   : > { %2373 = vmatpush2.bf16.msra.mxu1 %v3453_v63  ;;  %v3520_v63 = vld [vmem:[%s4828_s1 + $0x810] ss:$8 sps:$4 sm:$0xff]  }
  0xf9   : > { %2374 = vmatprep.subr.bf16.mxu1 %v3461_v0  ;;  %v3525_v0 = vld [vmem:[%s4828_s1 + $0x804] ss:$8 sps:$4 sm:$0xff]  }
  0xfa   : > { %2334 = vmatpush2.bf16.msra.mxu0 %v3456_v1  ;;  %v3523_v1 = vld [vmem:[%s4828_s1 + $0x800] ss:$8 sps:$4 sm:$0xff]  }
  0xfb   : > { %2335 = vmatprep.subr.bf16.mxu0 %v3464_v2  ;;  %v3528_v2 = vld [vmem:[%s4828_s1 + $0x8f4] ss:$8 sps:$4 sm:$0xff]  }
  0xfc   : > { %2375 = vmatpush2.bf16.msra.mxu1 %v3459_v3  ;;  %v3526_v3 = vld [vmem:[%s4828_s1 + $0x8f0] ss:$8 sps:$4 sm:$0xff]  }
  0xfd   : > { %2376 = vmatprep.subr.bf16.mxu1 %v3467_v4  ;;  %v3531_v4 = vld [vmem:[%s4828_s1 + $0x8e4] ss:$8 sps:$4 sm:$0xff]  }
  0xfe   : > { %2336 = vmatpush2.bf16.msra.mxu0 %v3462_v5  ;;  %v3529_v5 = vld [vmem:[%s4828_s1 + $0x8e0] ss:$8 sps:$4 sm:$0xff]  }
  0xff   : > { %2337 = vmatprep.subr.bf16.mxu0 %v3470_v6  ;;  %v3534_v6 = vld [vmem:[%s4828_s1 + $0x8d4] ss:$8 sps:$4 sm:$0xff]  }
 0x100   : > { %2377 = vmatpush2.bf16.msra.mxu1 %v3465_v7  ;;  %v3532_v7 = vld [vmem:[%s4828_s1 + $0x8d0] ss:$8 sps:$4 sm:$0xff]  }
 0x101   : > { %2378 = vmatprep.subr.bf16.mxu1 %v3473_v8  ;;  %v3537_v8 = vld [vmem:[%s4828_s1 + $0x8c4] ss:$8 sps:$4 sm:$0xff]  }
 0x102   : > { %2338 = vmatpush2.bf16.msra.mxu0 %v3468_v9  ;;  %v3535_v9 = vld [vmem:[%s4828_s1 + $0x8c0] ss:$8 sps:$4 sm:$0xff]  }
 0x103   : > { %2339 = vmatprep.subr.bf16.mxu0 %v3476_v10  ;;  %v3540_v10 = vld [vmem:[%s4828_s1 + $0x8b4] ss:$8 sps:$4 sm:$0xff]  }
 0x104   : > { %2379 = vmatpush2.bf16.msra.mxu1 %v3471_v11  ;;  %v3538_v11 = vld [vmem:[%s4828_s1 + $0x8b0] ss:$8 sps:$4 sm:$0xff]  }
 0x105   : > { %2380 = vmatprep.subr.bf16.mxu1 %v3479_v12  ;;  %v3543_v12 = vld [vmem:[%s4828_s1 + $0x8a4] ss:$8 sps:$4 sm:$0xff]  }
 0x106   : > { %2340 = vmatpush2.bf16.msra.mxu0 %v3474_v13  ;;  %v3541_v13 = vld [vmem:[%s4828_s1 + $0x8a0] ss:$8 sps:$4 sm:$0xff]  }
 0x107   : > { %2341 = vmatprep.subr.bf16.mxu0 %v3482_v15  ;;  %v3546_v15 = vld [vmem:[%s4828_s1 + $0x894] ss:$8 sps:$4 sm:$0xff]  }
 0x108   : > { %2381 = vmatpush2.bf16.msra.mxu1 %v3477_v16  ;;  %v3544_v16 = vld [vmem:[%s4828_s1 + $0x890] ss:$8 sps:$4 sm:$0xff]  }
 0x109   : > { %2382 = vmatprep.subr.bf16.mxu1 %v3485_v17  ;;  %v3549_v17 = vld [vmem:[%s4828_s1 + $0x884] ss:$8 sps:$4 sm:$0xff]  }
 0x10a   : > { %2342 = vmatpush2.bf16.msra.mxu0 %v3480_v20  ;;  %v3547_v20 = vld [vmem:[%s4828_s1 + $0x880] ss:$8 sps:$4 sm:$0xff]  }
 0x10b   : > { %2343 = vmatprep.subr.bf16.mxu0 %v3488_v21  ;;  %v2716_v21 = vcombine.low %v4552_v24, %v4552_v24 }
 0x10c   : > { %2383 = vmatpush2.bf16.msra.mxu1 %v3483_v23 }
 0x10d   : > { %2384 = vmatprep.subr.bf16.mxu1 %v3491_v25 }
 0x10e   : > { %2344 = vmatpush2.bf16.msra.mxu0 %v3486_v26 }
 0x10f   : > { %2345 = vmatprep.subr.bf16.mxu0 %v3494_v29 }
 0x110   : > { %2385 = vmatpush2.bf16.msra.mxu1 %v3489_v30 }
 0x111   : > { %2386 = vmatprep.subr.bf16.mxu1 %v3497_v18 }
 0x112   : > { %2346 = vmatpush2.bf16.msra.mxu0 %v3492_v14 }
 0x113   : > { %2397 = vmatprep.subr.bf16.mxu0 %v3502_v33 }
 0x114   : > { %2387 = vmatpush2.bf16.msra.mxu1 %v3495_v34 }
 0x115   : > { %v2103_v42 = vpop.f32.mrf.mxu0  ;;  %2348 = vmatmul.mubr.bf16.vlgmr.msra.gmra.mxu0 %v2712_v36 }
 0x116   : > { %v2104_v43 = vadd.f32 %v2103_v42, %v559_v37  ;;  %2398 = vmatpush1.bf16.msra.mxu0 %v3500_v38  ;;  %2429 = vmatprep.mubr.bf16.mxu0 %v2717_v39  ;;  %v2144_v46 = vpop.f32.mrf.mxu1 }
 0x117   : > { %v2105_v45 = vpop.f32.mrf.mxu0  ;;  %2389 = vmatmul.mubr.bf16.vlgmr.msra.gmra.mxu1 %v2714_v40  ;;  %2399 = vmatprep.subr.bf16.mxu0 %v3507_v41 }
 0x118   : > { %v2106_v47 = vadd.f32 %v2105_v45, %v563_v22  ;;  %v4580_v48 = vadd.f32 %v2144_v46, %v2104_v43  ;;  %v2146_v50 = vpop.f32.mrf.mxu1 }
 0x119   : > { %v2107_v49 = vpop.f32.mrf.mxu0 }
 0x11a   : > { %v4582_v51 = vadd.f32 %v2146_v50, %v2106_v47  ;;  %2400 = vmatpush1.bf16.msra.mxu0 %v3505_v44  ;;  %v2148_v55 = vpop.f32.mrf.mxu1  ;;  %v2524_v47 = vld [vmem:[%s4830_s3 + $0xf8] sm:$0xff]  ;;  %v2523_v49 = vld [vmem:[%s4830_s3 + $0xf0] sm:$0xff] }
 0x11b   : > { %v2108_v53 = vpop.f32.mrf.mxu0  ;;  %2401 = vmatprep.subr.bf16.mxu0 %v3510_v27  ;;  %3009 = vmatprep.subr.mxu1 %v2524_v47  ;;  %v2507_v50 = vld [vmem:[%s4830_s3 + $0x70] sm:$0xff]  ;;  %v2520_v55 = vld [vmem:[%s4830_s3 + $0xd8] sm:$0xff] }
 0x11c   : > { %v2149_v56 = vpop.f32.mrf.mxu1  ;;  %v2521_v53 = vld [vmem:[%s4830_s3 + $0xe0] sm:$0xff] }
 0x11d   : > { %v2504_v56 = vld [vmem:[%s4830_s3 + $0x58] sm:$0xff] }
 0x11e   : > { %2402 = vmatpush1.bf16.msra.mxu0 %v3508_v52  ;;  %v2506_v52 = vld [vmem:[%s4830_s3 + $0x68] sm:$0xff] }
 0x11f   : > { %2403 = vmatprep.subr.bf16.mxu0 %v3513_v54  ;;  %v2505_v54 = vld [vmem:[%s4830_s3 + $0x60] sm:$0xff] }
 0x122   : > { %2404 = vmatpush1.bf16.msra.mxu0 %v3511_v57  ;;  %v2519_v57 = vld [vmem:[%s4830_s3 + $0xd0] sm:$0xff] }
 0x123   : > { %2405 = vmatprep.subr.bf16.mxu0 %v3516_v58  ;;  %v2503_v58 = vld [vmem:[%s4830_s3 + $0x50] sm:$0xff] }
 0x126   : > { %2406 = vmatpush1.bf16.msra.mxu0 %v3514_v59  ;;  %v2518_v59 = vld [vmem:[%s4830_s3 + $0xc8] sm:$0xff] }
 0x127   : > { %2407 = vmatprep.subr.bf16.mxu0 %v3519_v60  ;;  %v2502_v60 = vld [vmem:[%s4830_s3 + $0x48] sm:$0xff] }
 0x12a   : > { %2408 = vmatpush1.bf16.msra.mxu0 %v3517_v61  ;;  %v2517_v61 = vld [vmem:[%s4830_s3 + $0xc0] sm:$0xff] }
 0x12b   : > { %2409 = vmatprep.subr.bf16.mxu0 %v3522_v62  ;;  %v2501_v62 = vld [vmem:[%s4830_s3 + $0x40] sm:$0xff] }
 0x12e   : > { %2410 = vmatpush1.bf16.msra.mxu0 %v3520_v63  ;;  %v2516_v63 = vld [vmem:[%s4830_s3 + $0xb8] sm:$0xff] }
 0x12f   : > { %2411 = vmatprep.subr.bf16.mxu0 %v3525_v0  ;;  %v2500_v0 = vld [vmem:[%s4830_s3 + $0x38] sm:$0xff] }
 0x132   : > { %2412 = vmatpush1.bf16.msra.mxu0 %v3523_v1  ;;  %v2515_v1 = vld [vmem:[%s4830_s3 + $0xb0] sm:$0xff] }
 0x133   : > { %2413 = vmatprep.subr.bf16.mxu0 %v3528_v2  ;;  %v2499_v2 = vld [vmem:[%s4830_s3 + $0x30] sm:$0xff] }
 0x136   : > { %2414 = vmatpush2.bf16.msra.mxu0 %v3526_v3  ;;  %v2514_v3 = vld [vmem:[%s4830_s3 + $0xa8] sm:$0xff] }
 0x137   : > { %2415 = vmatprep.subr.bf16.mxu0 %v3531_v4  ;;  %v2498_v4 = vld [vmem:[%s4830_s3 + $0x28] sm:$0xff] }
 0x13a   : > { %2416 = vmatpush2.bf16.msra.mxu0 %v3529_v5  ;;  %v2513_v5 = vld [vmem:[%s4830_s3 + $0xa0] sm:$0xff] }
 0x13b   : > { %2417 = vmatprep.subr.bf16.mxu0 %v3534_v6  ;;  %v2497_v6 = vld [vmem:[%s4830_s3 + $0x20] sm:$0xff] }
 0x13e   : > { %2418 = vmatpush2.bf16.msra.mxu0 %v3532_v7  ;;  %v2512_v7 = vld [vmem:[%s4830_s3 + $0x98] sm:$0xff] }
 0x13f   : > { %2419 = vmatprep.subr.bf16.mxu0 %v3537_v8  ;;  %v2496_v8 = vld [vmem:[%s4830_s3 + $0x18] sm:$0xff] }
 0x142   : > { %2420 = vmatpush2.bf16.msra.mxu0 %v3535_v9  ;;  %v2511_v9 = vld [vmem:[%s4830_s3 + $0x90] sm:$0xff] }
 0x143   : > { %2421 = vmatprep.subr.bf16.mxu0 %v3540_v10  ;;  %v2495_v10 = vld [vmem:[%s4830_s3 + $0x10] sm:$0xff] }
 0x146   : > { %2422 = vmatpush2.bf16.msra.mxu0 %v3538_v11  ;;  %v2510_v11 = vld [vmem:[%s4830_s3 + $0x88] sm:$0xff] }
 0x147   : > { %2423 = vmatprep.subr.bf16.mxu0 %v3543_v12  ;;  %v2494_v12 = vld [vmem:[%s4830_s3 + $0x8] sm:$0xff] }
 0x14a   : > { %2424 = vmatpush2.bf16.msra.mxu0 %v3541_v13  ;;  %v2509_v13 = vld [vmem:[%s4830_s3 + $0x80] sm:$0xff] }
 0x14b   : > { %2425 = vmatprep.subr.bf16.mxu0 %v3546_v15  ;;  %v2493_v15 = vld [vmem:[%s4830_s3] sm:$0xff] }
 0x14e   : > { %2426 = vmatpush2.bf16.msra.mxu0 %v3544_v16 }
 0x14f   : > { %2427 = vmatprep.subr.bf16.mxu0 %v3549_v17 }
 0x152   : > { %2428 = vmatpush2.bf16.msra.mxu0 %v3547_v20 }
 0x155   : > { %v2185_v23 = vpop.f32.mrf.mxu0  ;;  %2430 = vmatmul.mubr.bf16.vlgmr.msra.gmra.mxu0 %v2716_v21 }
 0x156   : > { %v2186_v25 = vadd.f32 %v2185_v23, %v4580_v48  ;;  %v2226_v29 = vpop.f32.mrf.mxu1  ;;  %v2508_v48 = vld [vmem:[%s4830_s3 + $0x78] sm:$0xff] }
 0x157   : > { %v2187_v26 = vpop.f32.mrf.mxu0  ;;  %3010 = vmatpush3.msra.mxu1 %v2508_v48 }
 0x158   : > { %v2188_v30 = vadd.f32 %v2187_v26, %v4582_v51  ;;  %v2227_v18 = vadd.f32 %v2226_v29, %v2186_v25  ;;  %v2228_v32 = vpop.f32.mrf.mxu1  ;;  %3011 = vmatprep.subr.mxu1 %v2523_v49  ;;  %v2522_v51 = vld [vmem:[%s4830_s3 + $0xe8] sm:$0xff] }
 0x159   : > { %v2189_v14 = vpop.f32.mrf.mxu0  ;;  %3012 = vmatpush3.msra.mxu1 %v2507_v50 }
 0x15a   : > { %v2229_v33 = vadd.f32 %v2228_v32, %v2188_v30  ;;  %v2230_v36 = vpop.f32.mrf.mxu1  ;;  %3013 = vmatprep.subr.mxu1 %v2522_v51 }
 0x15b   : > { %v2190_v34 = vpop.f32.mrf.mxu0  ;;  %3014 = vmatpush3.msra.mxu1 %v2506_v52 }
 0x15c   : > { %v2231_v37 = vpop.f32.mrf.mxu1  ;;  %3015 = vmatprep.subr.mxu1 %v2521_v53 }
 0x15d   : > { %3016 = vmatpush3.msra.mxu1 %v2505_v54 }
 0x15e   : > { %3017 = vmatprep.subr.mxu1 %v2520_v55 }
 0x15f   : > { %3018 = vmatpush3.msra.mxu1 %v2504_v56 }
 0x160   : > { %3019 = vmatprep.subr.mxu1 %v2519_v57 }
 0x161   : > { %3020 = vmatpush3.msra.mxu1 %v2503_v58 }
 0x162   : > { %3021 = vmatprep.subr.mxu1 %v2518_v59  ;;  %v2450_v59 = vld [vmem:[#allocation2] sm:$0x3] }
 0x163   : > { %3022 = vmatpush3.msra.mxu1 %v2502_v60 }
 0x164   : > { %3023 = vmatprep.subr.mxu1 %v2517_v61 }
 0x165   : > { %3024 = vmatpush3.msra.mxu1 %v2501_v62 }
 0x166   : > { %3025 = vmatprep.subr.mxu1 %v2516_v63 }
 0x167   : > { %3026 = vmatpush3.msra.mxu1 %v2500_v0 }
 0x168   : > { %3027 = vmatprep.subr.mxu1 %v2515_v1 }
 0x169   : > { %3028 = vmatpush3.msra.mxu1 %v2499_v2 }
 0x16a   : > { %3029 = vmatprep.subr.mxu1 %v2514_v3 }
 0x16b   : > { %3030 = vmatpush3.msra.mxu1 %v2498_v4 }
 0x16c   : > { %3031 = vmatprep.subr.mxu1 %v2513_v5 }
 0x16d   : > { %3032 = vmatpush3.msra.mxu1 %v2497_v6 }
 0x16e   : > { %3033 = vmatprep.subr.mxu1 %v2512_v7 }
 0x16f   : > { %3034 = vmatpush3.msra.mxu1 %v2496_v8 }
 0x170   : > { %3035 = vmatprep.subr.mxu1 %v2511_v9 }
 0x171   : > { %3036 = vmatpush3.msra.mxu1 %v2495_v10 }
 0x172   : > { %3037 = vmatprep.subr.mxu1 %v2510_v11 }
 0x173   : > { %3038 = vmatpush3.msra.mxu1 %v2494_v12 }
 0x174   : > { %3039 = vmatprep.subr.mxu1 %v2509_v13 }
 0x175   : > { %3040 = vmatpush3.msra.mxu1 %v2493_v15 }
 0x195   : > { %v2267_v38 = vpop.f32.mrf.mxu0 }
 0x196   : > { %v2268_v39 = vadd.f32 %v2267_v38, %v2227_v18 }
 0x197   : > { %v2269_v40 = vpop.f32.mrf.mxu0  ;;  %v2308_v24 = vpop.f32.mrf.mxu1 }
 0x198   : > { %v2270_v41 = vadd.f32 %v2269_v40, %v2229_v33  ;;  %v4669_v22 = vadd.f32 %v2308_v24, %v2268_v39 }
 0x199   : > { %v2271_v42 = vpop.f32.mrf.mxu0  ;;  %v2310_v43 = vpop.f32.mrf.mxu1 }
 0x19a   : > { %v4671_v44 = vadd.f32 %v2310_v43, %v2270_v41 }
 0x19b   : > { %v2272_v45 = vpop.f32.mrf.mxu0  ;;  %v2312_v46 = vpop.f32.mrf.mxu1 }
 0x19d   : > { %v2313_v27 = vpop.f32.mrf.mxu1 }
 0x1d5   : > { %v2349_v16 = vpop.f32.mrf.mxu0 }
 0x1d6   : > { %v2350_v30 = vadd.f32 %v2349_v16, %v4669_v22 }
 0x1d7   : > { %v2351_v17 = vpop.f32.mrf.mxu0  ;;  %v2390_v20 = vpop.f32.mrf.mxu1 }
 0x1d8   : > { %v2352_v18 = vadd.f32 %v2351_v17, %v4671_v44  ;;  %v2391_v14 = vadd.f32 %v2390_v20, %v2350_v30  ;;  %v3635_v44 = vmov 1966171168  }
 0x1d9   : > { %v2353_v21 = vpop.f32.mrf.mxu0  ;;  %v2392_v23 = vpop.f32.mrf.mxu1  ;;  %v2467_v47 = vunpack.c.l.s4 %v3635_v44 }
 0x1da   : > { %v2393_v33 = vadd.f32 %v2392_v23, %v2352_v18 }
 0x1db   : > { %v2354_v25 = vpop.f32.mrf.mxu0  ;;  %v2394_v26 = vpop.f32.mrf.mxu1  ;;  %v2468_v52 = vunpack.c.0.s8 %v2467_v47 }
 0x1dd   : > { %v2395_v29 = vpop.f32.mrf.mxu1  ;;  %v2471_v56 = vsub.s32 %v2468_v52, %v4530_v28 }
 0x215   : > { %v2431_v32 = vpop.f32.mrf.mxu0 }
 0x216   : > { %v2432_v34 = vadd.f32 %v2431_v32, %v2391_v14 }
 0x217   : > { %v2433_v36 = vpop.f32.mrf.mxu0 }
 0x218   : > { %v2438_v37 = vmax.f32 %v2432_v34, 0.0  ;;  %v2434_v38 = vadd.f32 %v2433_v36, %v2393_v33 }
 0x219   : > { %v2435_v39 = vpop.f32.mrf.mxu0 }
 0x21a   : > { %v2448_v40 = vsel %vm2445_vm1, %v2438_v37, 0.0  ;;  %v2439_v24 = vmax.f32 %v2434_v38, 0.0 }
 0x21b   : > { %v2451_v41 = vrot.slane %v2448_v40, 4  ;;  %v2436_v42 = vpop.f32.mrf.mxu0 }
 0x21c   : > { %v2449_v43 = vsel %vm2445_vm1, %v2439_v24, 0.0 }
 0x21d   : > { %v2452_v45 = vadd.f32 %v2451_v41, %v2448_v40  ;;  %v2457_v46 = vrot.slane %v2449_v43, 4 }
 0x21f   : > { %v2453_v22 = vrot.slane %v2452_v45, 2  ;;  %v2458_v27 = vadd.f32 %v2457_v46, %v2449_v43 }
 0x221   : > { %v2454_v48 = vadd.f32 %v2453_v22, %v2452_v45  ;;  %v2459_v49 = vrot.slane %v2458_v27, 2 }
 0x223   : > { %v2455_v50 = vrot.slane %v2454_v48, 1  ;;  %v2460_v51 = vadd.f32 %v2459_v49, %v2458_v27 }
 0x225   : > { %v2461_v53 = vrot.slane %v2460_v51, 1  ;;  %v2456_v54 = vadd.f32 %v2455_v50, %v2454_v48 }
 0x227   : > { %v2462_v55 = vadd.f32 %v2461_v53, %v2460_v51 }
 0x229   : > { %v2465_v57 = vcombine.low %v2456_v54, %v2462_v55 }
 0x22b   : > { %v2472_v58 = vrot.slane %v2465_v57, %v2471_v56 }
 0x22d   : > { %v2479_v60 = vrot.slane %v2472_v58, %v2471_v56 }
 0x22f   : > { %v2481_v61 = vadd.f32 %v2479_v60, %v2450_v59 }
 0x231   : > { %2486 = vst.msk [vmem:[#allocation2] sm:$0x3] %vm4148_vm0, %v2481_v61 }
 0x238   : > { %v2490_v62 = vld [vmem:[#allocation2] sm:$0x3] }
 0x239   : > { %v2491_v63 = vmul.f32 0.25, %v2490_v62 }
 0x23b   : > { %3552 = vtanh.f32 %v2491_v63 }
 0x248   : > { %v3553_v0 = vpop.eup %3552 }
 0x249   : > { %v2534_v1 = vrot.slane %v3553_v0, %v562_v35  ;;  %v2530_v2 = vrot.slane %v3553_v0, %v558_v31 }
 0x24b   : > { %2601 = vmatprep.mubr.f32.mxu1 %v2534_v1 }
 0x24c   : > { %2602 = vmatmul.mubr.f32.vlgmr.msra.gmra.mxu1 %v2530_v2 }
 0x30c   : > { %v3041_v3 = vpop.f32.mrf.mxu1 }
 0x30e   : > { %v3042_v4 = vpop.f32.mrf.mxu1 }
 0x30f   : > { %v3043_v5 = vadd.f32 %v3042_v4, %v3041_v3 }
 0x311   : > { %v2604_v6 = vadd.f32 %v3043_v5, %v2525_v19 }
 0x313   : > { %3554 = vtanh.f32 %v2604_v6 }
 0x320   : > { %v3555_v28 = vpop.eup %3554 }
 0x321   : > { %2608 = vst [vmem:[%s238_s14] sm:$0x1] %v3555_v28 }
 0x322   : > { %3569 = shalt.err (!%p3566_p5)
}
 0x323   : > { %s3570_s29 = scalar_lea.hbm %s4787_s24, 16  ;;  %s3574_s10 = scalar_lea.hbm %s4832_s5, 32 }
 0x324   : > { %p3571_p6 = scmp.ne.s32.totalorder %s4787_s24, %s3570_s29  ;;  %p3575_p10 = scmp.lt.s32.totalorder %s4787_s24, %s4832_s5 }
 0x325   : > { %p3576_p11 = scmp.lt.s32.totalorder %s3574_s10, %s3570_s29 }
 0x326   : > { %p3572_p7 = pnand %p3571_p6, %p3707_p4 }
 0x327   : > { %p3577_p12 = por %p3576_p11, %p3575_p10 }
 0x328   : > { %p3573_p9 = pneg %p3572_p7 }
 0x32a   : > { %p3578_p13 = pnand %p3577_p12, %p3573_p9 }
 0x32c   : > { %3581 = shalt.err (!%p3578_p13)
}
 0x32d   : > { %3045 = dma.vmem_to_hbm [thread:$0]  (%p3707_p4), %s2623_s11, 16, %s4787_s24, %s2610_s25  }
 0x32e PF: > { %p3051_p0 = scmp.ge.s32.totalorder %s3632_s23, 2  ;;  %s2634_s14 = sand.u32 1, %s3612_s18  }
 0x32f   : > { %s2635_s15 = scalar_lea.sflag [#allocation4], %s2634_s14 }
 0x330   : > { %p3048_p1 = pnand %p3051_p0, %p3714_p8 }
 0x332   : > { %p3049_p2 = pneg %p3048_p1 }
 0x334   : > { %3607 = dma.done.wait (%p3049_p2), %s2635_s15, 16  }
 0x335   : > { %3609 = vsyncadd (%p3049_p2), %s2635_s15, 4294967280  ;;  %s18_s23 = sadd.s32 1, %s3632_s23   ;;  %s4837_s18 = smov %s3616_s19 }
 0x336   : > { %p15_p3 = scmp.ge.s32.totalorder %s18_s23, 4   ;;  %s4838_s19 = smov %s3620_s20 }
 0x337   : > { %s4839_s20 = smov %s3720_s6  ;;  %s4840_s21 = smov %s3628_s22 }
 0x338   : > { %s4841_s22 = smov %s4843_s26  ;;  %17 = sbr.rel (!%p15_p3) target bundleno = 4 (0x4), region = 83 }
 0x33d   :  { %2639 = vsyncpa [#allocation4], 1 }
 0x33e   :  { %2641 = vsyncpa [#allocation4 + $0x1], 1 }

</bundles_post_ra>
